<compile_context>
chip_gen: v7x
topology: tpu7x:2x2x1
jax: 0.10.0
libtpu: 0.0.40
codegen_flags: <defaults>
</compile_context>

<pallas_src>
import numpy as np

import jax
import jax.numpy as jnp
from jax.experimental import pallas as pl
from jax.experimental.pallas import tpu as pltpu

LEAK = 0.2                   # LeakyReLU negative slope
EPS = 1e-5                   # PyTorch InstanceNorm2d default eps
K = 4                        # conv kernel size of every layer
MXU_DTYPE = jnp.bfloat16     # operand dtype for the conv-weight matmuls


def _leaky(y):
    return jnp.where(y > 0, y, LEAK * y)


# ----------------------------------------------------------------------------
# Fused forward kernel
# ----------------------------------------------------------------------------
def _conv(a, r_ref, m_ref):
    """Strided 4x4 conv on the 2-D (B*H, W*Cin) layout.

    a:     (B*H, W*Cin) f32 activation
    r_ref: (K, B*OH, B*H) 0/1 row selection (batch block-diagonal), f32
    m_ref: (K, W*Cin, OW*Cout) weight-scatter matrices (zero pad folded in)
    returns (B*OH, OW*Cout) f32
    """
    acc = None
    for kh in range(K):
        rows = jnp.dot(r_ref[kh], a, preferred_element_type=jnp.float32)
        part = jnp.dot(rows.astype(m_ref.dtype), m_ref[kh],
                       preferred_element_type=jnp.float32)
        acc = part if acc is None else acc + part
    return acc


def _disc_kernel(x_ref,
                 r1_ref, m1_ref, b1_ref,
                 r2_ref, m2_ref, u2_ref, t2_ref, tt2_ref, er2_ref, g2_ref, be2_ref,
                 r3_ref, m3_ref, u3_ref, t3_ref, tt3_ref, er3_ref, g3_ref, be3_ref,
                 s4_ref, w4_ref, b4_ref,
                 out_ref):
    f32 = jnp.float32

    a = x_ref[...]                                            # (B*32, 32*Cin)

    # ---- layer 1: Conv(k4,s2,p1) + bias + LeakyReLU ------------------------
    z = _conv(a, r1_ref, m1_ref) + b1_ref[...]                # (B*16, 16*fd)
    a = _leaky(z)

    # ---- layers 2-3: Conv(no bias) + InstanceNorm2d(affine) + LeakyReLU ----
    for (r_ref, m_ref, u_ref, t_ref, tt_ref, er_ref, g_ref, be_ref) in (
            (r2_ref, m2_ref, u2_ref, t2_ref, tt2_ref, er2_ref, g2_ref, be2_ref),
            (r3_ref, m3_ref, u3_ref, t3_ref, tt3_ref, er3_ref, g3_ref, be3_ref)):
        z = _conv(a, r_ref, m_ref)                            # (B*OH, OW*C)
        u = u_ref[...]
        t = t_ref[...]
        # per-sample, per-channel spatial stats (single pass, biased variance)
        mean = jnp.dot(jnp.dot(u, z, preferred_element_type=f32), t,
                       preferred_element_type=f32)            # (B, C)
        msq = jnp.dot(jnp.dot(u, z * z, preferred_element_type=f32), t,
                      preferred_element_type=f32)             # (B, C)
        var = jnp.maximum(msq - mean * mean, 0.0)
        rstd = jax.lax.rsqrt(var + EPS)
        scale = g_ref[...] * rstd                             # (B, C)
        shift = be_ref[...] - mean * scale                    # (B, C)
        # broadcast the (B, C) stats back to the (B*OH, OW*C) layout
        scale_e = jnp.dot(er_ref[...],
                          jnp.dot(scale, tt_ref[...], preferred_element_type=f32),
                          preferred_element_type=f32)
        shift_e = jnp.dot(er_ref[...],
                          jnp.dot(shift, tt_ref[...], preferred_element_type=f32),
                          preferred_element_type=f32)
        a = _leaky(z * scale_e + shift_e)

    # ---- layer 4: Conv(->1, k4, s2, p0)  (4x4x C3 -> scalar per sample) ----
    # The full 4x4 receptive field is exactly the remaining activation, so the
    # conv collapses to: elementwise multiply by the (batch-tiled) flattened
    # weight, reduce over lanes, then a tiny per-sample row-sum matmul.
    prod = a * w4_ref[...]                                    # (B*4, 4*C3)
    row_sum = jnp.sum(prod, axis=1, keepdims=True)            # (B*4, 1)
    out_ref[...] = jnp.dot(s4_ref[...], row_sum,
                           preferred_element_type=f32) + b4_ref[...]


# ----------------------------------------------------------------------------
# Host-side constant construction (tiny matrices, built once per forward)
# ----------------------------------------------------------------------------
def _row_select(Bb, H, OH, stride, pad):
    """R[kh, b*OH+oh, b*H+h] = 1 iff h == stride*oh + kh - pad (in range)."""
    R = np.zeros((K, Bb * OH, Bb * H), np.float32)
    for kh in range(K):
        for b in range(Bb):
            for oh in range(OH):
                h = stride * oh + kh - pad
                if 0 <= h < H:
                    R[kh, b * OH + oh, b * H + h] = 1.0
    return jnp.asarray(R)


def _weight_scatter(w, W, OW, stride, pad):
    """M[kh, w*Ci+ci, ow*Co+co] = w[kh, kw, ci, co], kw = w - stride*ow + pad.

    Out-of-range columns (zero padding) simply drop out of the map.
    w: conv weights, shape (K, K, Ci, Co).
    """
    Ci, Co = w.shape[2], w.shape[3]
    G = np.zeros((K, W, OW), np.float32)
    for kw in range(K):
        for ow in range(OW):
            col = stride * ow + kw - pad
            if 0 <= col < W:
                G[kw, col, ow] = 1.0
    M = jnp.einsum("kwo,hkic->hwioc", jnp.asarray(G), w)      # (K, W, Ci, OW, Co)
    return M.reshape(K, W * Ci, OW * Co)


def _conv_consts(w, Bb, H, W, stride, pad):
    OH = (H + 2 * pad - K) // stride + 1
    OW = (W + 2 * pad - K) // stride + 1
    return (_row_select(Bb, H, OH, stride, pad),
            _weight_scatter(w, W, OW, stride, pad), OH, OW)


def _inorm_consts(Bb, OH, OW, C):
    """Per-sample averaging (U), per-channel fold (T / T^T), row expand (Er)."""
    U = np.zeros((Bb, Bb * OH), np.float32)
    Er = np.zeros((Bb * OH, Bb), np.float32)
    for b in range(Bb):
        U[b, b * OH:(b + 1) * OH] = 1.0 / (OH * OW)
        Er[b * OH:(b + 1) * OH, b] = 1.0
    T = np.zeros((OW * C, C), np.float32)
    for ow in range(OW):
        T[ow * C:(ow + 1) * C, :] = np.eye(C, dtype=np.float32)
    return (jnp.asarray(U), jnp.asarray(T),
            jnp.asarray(np.ascontiguousarray(T.T)), jnp.asarray(Er))


# ----------------------------------------------------------------------------
# Parameters + forward wrapper
# ----------------------------------------------------------------------------
def init_params(key, channels_img, features_d):
    """Random parameters. Conv weights are HWIO (K,K,Cin,Cout) =
    torch_w.permute(2,3,1,0)."""
    fd = features_d
    cfg = [
        (channels_img, fd,     2, 1, "conv_lrelu"),
        (fd,           fd * 2, 2, 1, "block"),
        (fd * 2,       fd * 4, 2, 1, "block"),
        (fd * 4,       1,      2, 0, "conv_out"),
    ]
    params = []
    for (cin, cout, s, p, kind) in cfg:
        key, kw_, kb_, kg_ = jax.random.split(key, 4)
        layer = dict(kind=kind, s=s, p=p, cout=cout,
                     w=0.05 * jax.random.normal(kw_, (K, K, cin, cout), jnp.float32))
        if kind == "block":
            layer["gamma"] = 1.0 + 0.05 * jax.random.normal(kg_, (1, cout), jnp.float32)
            layer["beta"] = 0.05 * jax.random.normal(kb_, (1, cout), jnp.float32)
        else:
            layer["b"] = 0.05 * jax.random.normal(kb_, (1, cout), jnp.float32)
        params.append(layer)
    return params


def discriminator_forward(x_nchw, params, block_batch=None):
    """Forward pass of Discriminator (img_size=32, condi=False) -> (N,1,1,1)."""
    N, Cin, H, W = x_nchw.shape
    assert H == 32 and W == 32, "only the img_size=32 branch is implemented"
    Bb = N if block_batch is None else block_batch
    assert N % Bb == 0

    l1, l2, l3, l4 = params

    R1, M1, OH1, OW1 = _conv_consts(l1["w"], Bb, H, W, l1["s"], l1["p"])
    b1e = jnp.tile(l1["b"], (1, OW1))                          # (1, OW1*C1)

    R2, M2, OH2, OW2 = _conv_consts(l2["w"], Bb, OH1, OW1, l2["s"], l2["p"])
    U2, T2, Tt2, Er2 = _inorm_consts(Bb, OH2, OW2, l2["cout"])

    R3, M3, OH3, OW3 = _conv_consts(l3["w"], Bb, OH2, OW2, l3["s"], l3["p"])
    U3, T3, Tt3, Er3 = _inorm_consts(Bb, OH3, OW3, l3["cout"])

    # Layer 4: k=4, s=2, p=0 on a (OH3=4, OW3=4) map -> a single scalar per
    # sample: a flat dot of the full activation with the flattened weight.
    C3 = l3["cout"]
    assert OH3 == K and OW3 == K and l4["p"] == 0 and l4["cout"] == 1
    W4full = l4["w"].reshape(K, K * C3)                        # (4, 4*C3)
    W4tile = jnp.tile(W4full, (Bb, 1))                         # (Bb*4, 4*C3)
    S4 = np.zeros((Bb, Bb * K), np.float32)                    # per-sample sum
    for b in range(Bb):
        S4[b, b * K:(b + 1) * K] = 1.0
    S4 = jnp.asarray(S4)
    b4 = l4["b"]                                               # (1, 1)

    # NCHW -> 2-D activation layout  A[b*H + h, w*C + c]
    x2d = jnp.transpose(x_nchw, (0, 2, 3, 1)).astype(jnp.float32)
    x2d = x2d.reshape(N * H, W * Cin)

    consts = [
        R1, M1.astype(MXU_DTYPE), b1e,
        R2, M2.astype(MXU_DTYPE), U2, T2, Tt2, Er2, l2["gamma"], l2["beta"],
        R3, M3.astype(MXU_DTYPE), U3, T3, Tt3, Er3, l3["gamma"], l3["beta"],
        S4, W4tile, b4,
    ]

    in_specs = [pl.BlockSpec((Bb * H, W * Cin), lambda n: (n, 0))]
    in_specs += [pl.BlockSpec(c.shape, lambda n, _nd=c.ndim: (0,) * _nd)
                 for c in consts]

    out = pl.pallas_call(
        _disc_kernel,
        out_shape=jax.ShapeDtypeStruct((N, 1), jnp.float32),
        grid=(N // Bb,),
        in_specs=in_specs,
        out_specs=pl.BlockSpec((Bb, 1), lambda n: (n, 0)),
        compiler_params=pltpu.CompilerParams(dimension_semantics=("parallel",)),
    )(x2d, *consts)
    return out.reshape(N, 1, 1, 1)


# ----------------------------------------------------------------------------
# Pure-JAX (XLA) reference for validation
# ----------------------------------------------------------------------------
def reference_forward(x_nchw, params):
    x = jnp.transpose(x_nchw, (0, 2, 3, 1)).astype(jnp.float32)      # NHWC
    for layer in params:
        s, p = layer["s"], layer["p"]
        y = jax.lax.conv_general_dilated(
            x, layer["w"], window_strides=(s, s), padding=[(p, p), (p, p)],
            dimension_numbers=("NHWC", "HWIO", "NHWC"))
        if layer["kind"] == "block":
            mean = jnp.mean(y, axis=(1, 2), keepdims=True)
            var = jnp.var(y, axis=(1, 2), keepdims=True)
            y = (y - mean) * jax.lax.rsqrt(var + EPS)
            y = y * layer["gamma"].reshape(1, 1, 1, -1) + layer["beta"].reshape(1, 1, 1, -1)
            y = _leaky(y)
        else:
            y = y + layer["b"].reshape(1, 1, 1, -1)
            if layer["kind"] == "conv_lrelu":
                y = _leaky(y)
        x = y
    return jnp.transpose(x, (0, 3, 1, 2))                            # (N,1,1,1)


if __name__ == "__main__":
    channels_img, features_d, img_size, batch = 3, 8, 32, 2

    key = jax.random.PRNGKey(0)
    kx, kp = jax.random.split(key)
    x = jax.random.normal(kx, (batch, channels_img, img_size, img_size), jnp.float32)
    params = init_params(kp, channels_img, features_d)

    out = jax.block_until_ready(discriminator_forward(x, params))
    assert out.shape == (batch, 1, 1, 1), out.shape
    assert bool(jnp.all(jnp.isfinite(out)))

    # sanity check against a pure-XLA reference (bf16 MXU operands -> loose tol)
    ref = jax.block_until_ready(reference_forward(x, params))
    tol = 5e-2 * max(1.0, float(jnp.max(jnp.abs(ref))))
    err = float(jnp.max(jnp.abs(out - ref)))
    assert err < tol, f"kernel/reference mismatch: max abs err {err} (tol {tol})"

    print("KERNEL_OK")
</pallas_src>

<mosaic_0001>
module attributes {stable_mosaic.version = 11 : i64} {
  func.func @_disc_kernel(%arg0: i32, %arg1: memref<64x96xf32, #tpu.memory_space<vmem>>, %arg2: memref<4x32x64xf32, #tpu.memory_space<vmem>>, %arg3: memref<4x96x128xbf16, #tpu.memory_space<vmem>>, %arg4: memref<1x128xf32, #tpu.memory_space<vmem>>, %arg5: memref<4x16x32xf32, #tpu.memory_space<vmem>>, %arg6: memref<4x128x128xbf16, #tpu.memory_space<vmem>>, %arg7: memref<2x16xf32, #tpu.memory_space<vmem>>, %arg8: memref<128x16xf32, #tpu.memory_space<vmem>>, %arg9: memref<16x128xf32, #tpu.memory_space<vmem>>, %arg10: memref<16x2xf32, #tpu.memory_space<vmem>>, %arg11: memref<1x16xf32, #tpu.memory_space<vmem>>, %arg12: memref<1x16xf32, #tpu.memory_space<vmem>>, %arg13: memref<4x8x16xf32, #tpu.memory_space<vmem>>, %arg14: memref<4x128x128xbf16, #tpu.memory_space<vmem>>, %arg15: memref<2x8xf32, #tpu.memory_space<vmem>>, %arg16: memref<128x32xf32, #tpu.memory_space<vmem>>, %arg17: memref<32x128xf32, #tpu.memory_space<vmem>>, %arg18: memref<8x2xf32, #tpu.memory_space<vmem>>, %arg19: memref<1x32xf32, #tpu.memory_space<vmem>>, %arg20: memref<1x32xf32, #tpu.memory_space<vmem>>, %arg21: memref<2x8xf32, #tpu.memory_space<vmem>>, %arg22: memref<8x128xf32, #tpu.memory_space<vmem>>, %arg23: memref<1x1xf32, #tpu.memory_space<vmem>>, %arg24: memref<2x1xf32, #tpu.memory_space<vmem>>) attributes {dimension_semantics = [#tpu.dimension_semantics<parallel>], iteration_bounds = array<i64: 1>, scalar_prefetch = 0 : i64, scratch_operands = 0 : i64, tpu.core_type = #tpu.core_type<tc>, window_params = [{transform_indices = @transform_0, window_bounds = array<i64: 64, 96>}, {pipeline_mode = #tpu.pipeline_mode<synchronous>, transform_indices = @transform_1, window_bounds = array<i64: 4, 32, 64>}, {pipeline_mode = #tpu.pipeline_mode<synchronous>, transform_indices = @transform_2, window_bounds = array<i64: 4, 96, 128>}, {pipeline_mode = #tpu.pipeline_mode<synchronous>, transform_indices = @transform_3, window_bounds = array<i64: 1, 128>}, {pipeline_mode = #tpu.pipeline_mode<synchronous>, transform_indices = @transform_4, window_bounds = array<i64: 4, 16, 32>}, {pipeline_mode = #tpu.pipeline_mode<synchronous>, transform_indices = @transform_5, window_bounds = array<i64: 4, 128, 128>}, {pipeline_mode = #tpu.pipeline_mode<synchronous>, transform_indices = @transform_6, window_bounds = array<i64: 2, 16>}, {pipeline_mode = #tpu.pipeline_mode<synchronous>, transform_indices = @transform_7, window_bounds = array<i64: 128, 16>}, {pipeline_mode = #tpu.pipeline_mode<synchronous>, transform_indices = @transform_8, window_bounds = array<i64: 16, 128>}, {pipeline_mode = #tpu.pipeline_mode<synchronous>, transform_indices = @transform_9, window_bounds = array<i64: 16, 2>}, {pipeline_mode = #tpu.pipeline_mode<synchronous>, transform_indices = @transform_10, window_bounds = array<i64: 1, 16>}, {pipeline_mode = #tpu.pipeline_mode<synchronous>, transform_indices = @transform_11, window_bounds = array<i64: 1, 16>}, {pipeline_mode = #tpu.pipeline_mode<synchronous>, transform_indices = @transform_12, window_bounds = array<i64: 4, 8, 16>}, {pipeline_mode = #tpu.pipeline_mode<synchronous>, transform_indices = @transform_13, window_bounds = array<i64: 4, 128, 128>}, {pipeline_mode = #tpu.pipeline_mode<synchronous>, transform_indices = @transform_14, window_bounds = array<i64: 2, 8>}, {pipeline_mode = #tpu.pipeline_mode<synchronous>, transform_indices = @transform_15, window_bounds = array<i64: 128, 32>}, {pipeline_mode = #tpu.pipeline_mode<synchronous>, transform_indices = @transform_16, window_bounds = array<i64: 32, 128>}, {pipeline_mode = #tpu.pipeline_mode<synchronous>, transform_indices = @transform_17, window_bounds = array<i64: 8, 2>}, {pipeline_mode = #tpu.pipeline_mode<synchronous>, transform_indices = @transform_18, window_bounds = array<i64: 1, 32>}, {pipeline_mode = #tpu.pipeline_mode<synchronous>, transform_indices = @transform_19, window_bounds = array<i64: 1, 32>}, {pipeline_mode = #tpu.pipeline_mode<synchronous>, transform_indices = @transform_20, window_bounds = array<i64: 2, 8>}, {pipeline_mode = #tpu.pipeline_mode<synchronous>, transform_indices = @transform_21, window_bounds = array<i64: 8, 128>}, {pipeline_mode = #tpu.pipeline_mode<synchronous>, transform_indices = @transform_22, window_bounds = array<i64: 1, 1>}, {transform_indices = @transform_23, window_bounds = array<i64: 2, 1>}]} {
    %c0 = arith.constant 0 : index
    %c0_0 = arith.constant 0 : index
    %0 = vector.load %arg1[%c0, %c0_0] : memref<64x96xf32, #tpu.memory_space<vmem>>, vector<64x96xf32>
    %c0_1 = arith.constant 0 : index
    %c0_2 = arith.constant 0 : index
    %c0_3 = arith.constant 0 : index
    %1 = vector.load %arg2[%c0_1, %c0_2, %c0_3] : memref<4x32x64xf32, #tpu.memory_space<vmem>>, vector<1x32x64xf32>
    %2 = vector.shape_cast %1 : vector<1x32x64xf32> to vector<32x64xf32>
    %cst = arith.constant dense<0.000000e+00> : vector<32x96xf32>
    %3 = tpu.matmul %2, %0, %cst {dimension_numbers = #tpu.dot_dimension_numbers<[1], [0], [0], [1], [0, 0, 1, 1], [], []>} : vector<32x64xf32>, vector<64x96xf32>, vector<32x96xf32> -> vector<32x96xf32>
    %4 = arith.truncf %3 : vector<32x96xf32> to vector<32x96xbf16>
    %c0_4 = arith.constant 0 : index
    %c0_5 = arith.constant 0 : index
    %c0_6 = arith.constant 0 : index
    %5 = vector.load %arg3[%c0_4, %c0_5, %c0_6] : memref<4x96x128xbf16, #tpu.memory_space<vmem>>, vector<1x96x128xbf16>
    %6 = vector.shape_cast %5 : vector<1x96x128xbf16> to vector<96x128xbf16>
    %cst_7 = arith.constant dense<0.000000e+00> : vector<32x128xf32>
    %7 = tpu.matmul %4, %6, %cst_7 {dimension_numbers = #tpu.dot_dimension_numbers<[1], [0], [0], [1], [0, 0, 1, 1], [], []>} : vector<32x96xbf16>, vector<96x128xbf16>, vector<32x128xf32> -> vector<32x128xf32>
    %c1 = arith.constant 1 : index
    %c0_8 = arith.constant 0 : index
    %c0_9 = arith.constant 0 : index
    %8 = vector.load %arg2[%c1, %c0_8, %c0_9] : memref<4x32x64xf32, #tpu.memory_space<vmem>>, vector<1x32x64xf32>
    %9 = vector.shape_cast %8 : vector<1x32x64xf32> to vector<32x64xf32>
    %cst_10 = arith.constant dense<0.000000e+00> : vector<32x96xf32>
    %10 = tpu.matmul %9, %0, %cst_10 {dimension_numbers = #tpu.dot_dimension_numbers<[1], [0], [0], [1], [0, 0, 1, 1], [], []>} : vector<32x64xf32>, vector<64x96xf32>, vector<32x96xf32> -> vector<32x96xf32>
    %11 = arith.truncf %10 : vector<32x96xf32> to vector<32x96xbf16>
    %c1_11 = arith.constant 1 : index
    %c0_12 = arith.constant 0 : index
    %c0_13 = arith.constant 0 : index
    %12 = vector.load %arg3[%c1_11, %c0_12, %c0_13] : memref<4x96x128xbf16, #tpu.memory_space<vmem>>, vector<1x96x128xbf16>
    %13 = vector.shape_cast %12 : vector<1x96x128xbf16> to vector<96x128xbf16>
    %cst_14 = arith.constant dense<0.000000e+00> : vector<32x128xf32>
    %14 = tpu.matmul %11, %13, %cst_14 {dimension_numbers = #tpu.dot_dimension_numbers<[1], [0], [0], [1], [0, 0, 1, 1], [], []>} : vector<32x96xbf16>, vector<96x128xbf16>, vector<32x128xf32> -> vector<32x128xf32>
    %15 = arith.addf %7, %14 : vector<32x128xf32>
    %c2 = arith.constant 2 : index
    %c0_15 = arith.constant 0 : index
    %c0_16 = arith.constant 0 : index
    %16 = vector.load %arg2[%c2, %c0_15, %c0_16] : memref<4x32x64xf32, #tpu.memory_space<vmem>>, vector<1x32x64xf32>
    %17 = vector.shape_cast %16 : vector<1x32x64xf32> to vector<32x64xf32>
    %cst_17 = arith.constant dense<0.000000e+00> : vector<32x96xf32>
    %18 = tpu.matmul %17, %0, %cst_17 {dimension_numbers = #tpu.dot_dimension_numbers<[1], [0], [0], [1], [0, 0, 1, 1], [], []>} : vector<32x64xf32>, vector<64x96xf32>, vector<32x96xf32> -> vector<32x96xf32>
    %19 = arith.truncf %18 : vector<32x96xf32> to vector<32x96xbf16>
    %c2_18 = arith.constant 2 : index
    %c0_19 = arith.constant 0 : index
    %c0_20 = arith.constant 0 : index
    %20 = vector.load %arg3[%c2_18, %c0_19, %c0_20] : memref<4x96x128xbf16, #tpu.memory_space<vmem>>, vector<1x96x128xbf16>
    %21 = vector.shape_cast %20 : vector<1x96x128xbf16> to vector<96x128xbf16>
    %cst_21 = arith.constant dense<0.000000e+00> : vector<32x128xf32>
    %22 = tpu.matmul %19, %21, %cst_21 {dimension_numbers = #tpu.dot_dimension_numbers<[1], [0], [0], [1], [0, 0, 1, 1], [], []>} : vector<32x96xbf16>, vector<96x128xbf16>, vector<32x128xf32> -> vector<32x128xf32>
    %23 = arith.addf %15, %22 : vector<32x128xf32>
    %c3 = arith.constant 3 : index
    %c0_22 = arith.constant 0 : index
    %c0_23 = arith.constant 0 : index
    %24 = vector.load %arg2[%c3, %c0_22, %c0_23] : memref<4x32x64xf32, #tpu.memory_space<vmem>>, vector<1x32x64xf32>
    %25 = vector.shape_cast %24 : vector<1x32x64xf32> to vector<32x64xf32>
    %cst_24 = arith.constant dense<0.000000e+00> : vector<32x96xf32>
    %26 = tpu.matmul %25, %0, %cst_24 {dimension_numbers = #tpu.dot_dimension_numbers<[1], [0], [0], [1], [0, 0, 1, 1], [], []>} : vector<32x64xf32>, vector<64x96xf32>, vector<32x96xf32> -> vector<32x96xf32>
    %27 = arith.truncf %26 : vector<32x96xf32> to vector<32x96xbf16>
    %c3_25 = arith.constant 3 : index
    %c0_26 = arith.constant 0 : index
    %c0_27 = arith.constant 0 : index
    %28 = vector.load %arg3[%c3_25, %c0_26, %c0_27] : memref<4x96x128xbf16, #tpu.memory_space<vmem>>, vector<1x96x128xbf16>
    %29 = vector.shape_cast %28 : vector<1x96x128xbf16> to vector<96x128xbf16>
    %cst_28 = arith.constant dense<0.000000e+00> : vector<32x128xf32>
    %30 = tpu.matmul %27, %29, %cst_28 {dimension_numbers = #tpu.dot_dimension_numbers<[1], [0], [0], [1], [0, 0, 1, 1], [], []>} : vector<32x96xbf16>, vector<96x128xbf16>, vector<32x128xf32> -> vector<32x128xf32>
    %31 = arith.addf %23, %30 : vector<32x128xf32>
    %c0_29 = arith.constant 0 : index
    %c0_30 = arith.constant 0 : index
    %32 = vector.load %arg4[%c0_29, %c0_30] : memref<1x128xf32, #tpu.memory_space<vmem>>, vector<1x128xf32>
    %33 = vector.broadcast %32 : vector<1x128xf32> to vector<32x128xf32>
    %34 = arith.addf %31, %33 : vector<32x128xf32>
    %cst_31 = arith.constant 0.000000e+00 : f32
    %35 = vector.broadcast %cst_31 : f32 to vector<32x128xf32>
    %36 = arith.cmpf ogt, %34, %35 : vector<32x128xf32>
    %cst_32 = arith.constant 2.000000e-01 : f32
    %37 = vector.broadcast %cst_32 : f32 to vector<32x128xf32>
    %38 = arith.mulf %37, %34 : vector<32x128xf32>
    %39 = arith.select %36, %34, %38 : vector<32x128xi1>, vector<32x128xf32>
    %c0_33 = arith.constant 0 : index
    %c0_34 = arith.constant 0 : index
    %c0_35 = arith.constant 0 : index
    %40 = vector.load %arg5[%c0_33, %c0_34, %c0_35] : memref<4x16x32xf32, #tpu.memory_space<vmem>>, vector<1x16x32xf32>
    %41 = vector.shape_cast %40 : vector<1x16x32xf32> to vector<16x32xf32>
    %cst_36 = arith.constant dense<0.000000e+00> : vector<16x128xf32>
    %42 = tpu.matmul %41, %39, %cst_36 {dimension_numbers = #tpu.dot_dimension_numbers<[1], [0], [0], [1], [0, 0, 1, 1], [], []>} : vector<16x32xf32>, vector<32x128xf32>, vector<16x128xf32> -> vector<16x128xf32>
    %43 = arith.truncf %42 : vector<16x128xf32> to vector<16x128xbf16>
    %c0_37 = arith.constant 0 : index
    %c0_38 = arith.constant 0 : index
    %c0_39 = arith.constant 0 : index
    %44 = vector.load %arg6[%c0_37, %c0_38, %c0_39] : memref<4x128x128xbf16, #tpu.memory_space<vmem>>, vector<1x128x128xbf16>
    %45 = vector.shape_cast %44 : vector<1x128x128xbf16> to vector<128x128xbf16>
    %cst_40 = arith.constant dense<0.000000e+00> : vector<16x128xf32>
    %46 = tpu.matmul %43, %45, %cst_40 {dimension_numbers = #tpu.dot_dimension_numbers<[1], [0], [0], [1], [0, 0, 1, 1], [], []>} : vector<16x128xbf16>, vector<128x128xbf16>, vector<16x128xf32> -> vector<16x128xf32>
    %c1_41 = arith.constant 1 : index
    %c0_42 = arith.constant 0 : index
    %c0_43 = arith.constant 0 : index
    %47 = vector.load %arg5[%c1_41, %c0_42, %c0_43] : memref<4x16x32xf32, #tpu.memory_space<vmem>>, vector<1x16x32xf32>
    %48 = vector.shape_cast %47 : vector<1x16x32xf32> to vector<16x32xf32>
    %cst_44 = arith.constant dense<0.000000e+00> : vector<16x128xf32>
    %49 = tpu.matmul %48, %39, %cst_44 {dimension_numbers = #tpu.dot_dimension_numbers<[1], [0], [0], [1], [0, 0, 1, 1], [], []>} : vector<16x32xf32>, vector<32x128xf32>, vector<16x128xf32> -> vector<16x128xf32>
    %50 = arith.truncf %49 : vector<16x128xf32> to vector<16x128xbf16>
    %c1_45 = arith.constant 1 : index
    %c0_46 = arith.constant 0 : index
    %c0_47 = arith.constant 0 : index
    %51 = vector.load %arg6[%c1_45, %c0_46, %c0_47] : memref<4x128x128xbf16, #tpu.memory_space<vmem>>, vector<1x128x128xbf16>
    %52 = vector.shape_cast %51 : vector<1x128x128xbf16> to vector<128x128xbf16>
    %cst_48 = arith.constant dense<0.000000e+00> : vector<16x128xf32>
    %53 = tpu.matmul %50, %52, %cst_48 {dimension_numbers = #tpu.dot_dimension_numbers<[1], [0], [0], [1], [0, 0, 1, 1], [], []>} : vector<16x128xbf16>, vector<128x128xbf16>, vector<16x128xf32> -> vector<16x128xf32>
    %54 = arith.addf %46, %53 : vector<16x128xf32>
    %c2_49 = arith.constant 2 : index
    %c0_50 = arith.constant 0 : index
    %c0_51 = arith.constant 0 : index
    %55 = vector.load %arg5[%c2_49, %c0_50, %c0_51] : memref<4x16x32xf32, #tpu.memory_space<vmem>>, vector<1x16x32xf32>
    %56 = vector.shape_cast %55 : vector<1x16x32xf32> to vector<16x32xf32>
    %cst_52 = arith.constant dense<0.000000e+00> : vector<16x128xf32>
    %57 = tpu.matmul %56, %39, %cst_52 {dimension_numbers = #tpu.dot_dimension_numbers<[1], [0], [0], [1], [0, 0, 1, 1], [], []>} : vector<16x32xf32>, vector<32x128xf32>, vector<16x128xf32> -> vector<16x128xf32>
    %58 = arith.truncf %57 : vector<16x128xf32> to vector<16x128xbf16>
    %c2_53 = arith.constant 2 : index
    %c0_54 = arith.constant 0 : index
    %c0_55 = arith.constant 0 : index
    %59 = vector.load %arg6[%c2_53, %c0_54, %c0_55] : memref<4x128x128xbf16, #tpu.memory_space<vmem>>, vector<1x128x128xbf16>
    %60 = vector.shape_cast %59 : vector<1x128x128xbf16> to vector<128x128xbf16>
    %cst_56 = arith.constant dense<0.000000e+00> : vector<16x128xf32>
    %61 = tpu.matmul %58, %60, %cst_56 {dimension_numbers = #tpu.dot_dimension_numbers<[1], [0], [0], [1], [0, 0, 1, 1], [], []>} : vector<16x128xbf16>, vector<128x128xbf16>, vector<16x128xf32> -> vector<16x128xf32>
    %62 = arith.addf %54, %61 : vector<16x128xf32>
    %c3_57 = arith.constant 3 : index
    %c0_58 = arith.constant 0 : index
    %c0_59 = arith.constant 0 : index
    %63 = vector.load %arg5[%c3_57, %c0_58, %c0_59] : memref<4x16x32xf32, #tpu.memory_space<vmem>>, vector<1x16x32xf32>
    %64 = vector.shape_cast %63 : vector<1x16x32xf32> to vector<16x32xf32>
    %cst_60 = arith.constant dense<0.000000e+00> : vector<16x128xf32>
    %65 = tpu.matmul %64, %39, %cst_60 {dimension_numbers = #tpu.dot_dimension_numbers<[1], [0], [0], [1], [0, 0, 1, 1], [], []>} : vector<16x32xf32>, vector<32x128xf32>, vector<16x128xf32> -> vector<16x128xf32>
    %66 = arith.truncf %65 : vector<16x128xf32> to vector<16x128xbf16>
    %c3_61 = arith.constant 3 : index
    %c0_62 = arith.constant 0 : index
    %c0_63 = arith.constant 0 : index
    %67 = vector.load %arg6[%c3_61, %c0_62, %c0_63] : memref<4x128x128xbf16, #tpu.memory_space<vmem>>, vector<1x128x128xbf16>
    %68 = vector.shape_cast %67 : vector<1x128x128xbf16> to vector<128x128xbf16>
    %cst_64 = arith.constant dense<0.000000e+00> : vector<16x128xf32>
    %69 = tpu.matmul %66, %68, %cst_64 {dimension_numbers = #tpu.dot_dimension_numbers<[1], [0], [0], [1], [0, 0, 1, 1], [], []>} : vector<16x128xbf16>, vector<128x128xbf16>, vector<16x128xf32> -> vector<16x128xf32>
    %70 = arith.addf %62, %69 : vector<16x128xf32>
    %c0_65 = arith.constant 0 : index
    %c0_66 = arith.constant 0 : index
    %71 = vector.load %arg7[%c0_65, %c0_66] : memref<2x16xf32, #tpu.memory_space<vmem>>, vector<2x16xf32>
    %c0_67 = arith.constant 0 : index
    %c0_68 = arith.constant 0 : index
    %72 = vector.load %arg8[%c0_67, %c0_68] : memref<128x16xf32, #tpu.memory_space<vmem>>, vector<128x16xf32>
    %cst_69 = arith.constant dense<0.000000e+00> : vector<2x128xf32>
    %73 = tpu.matmul %71, %70, %cst_69 {dimension_numbers = #tpu.dot_dimension_numbers<[1], [0], [0], [1], [0, 0, 1, 1], [], []>} : vector<2x16xf32>, vector<16x128xf32>, vector<2x128xf32> -> vector<2x128xf32>
    %cst_70 = arith.constant dense<0.000000e+00> : vector<2x16xf32>
    %74 = tpu.matmul %73, %72, %cst_70 {dimension_numbers = #tpu.dot_dimension_numbers<[1], [0], [0], [1], [0, 0, 1, 1], [], []>} : vector<2x128xf32>, vector<128x16xf32>, vector<2x16xf32> -> vector<2x16xf32>
    %75 = arith.mulf %70, %70 : vector<16x128xf32>
    %cst_71 = arith.constant dense<0.000000e+00> : vector<2x128xf32>
    %76 = tpu.matmul %71, %75, %cst_71 {dimension_numbers = #tpu.dot_dimension_numbers<[1], [0], [0], [1], [0, 0, 1, 1], [], []>} : vector<2x16xf32>, vector<16x128xf32>, vector<2x128xf32> -> vector<2x128xf32>
    %cst_72 = arith.constant dense<0.000000e+00> : vector<2x16xf32>
    %77 = tpu.matmul %76, %72, %cst_72 {dimension_numbers = #tpu.dot_dimension_numbers<[1], [0], [0], [1], [0, 0, 1, 1], [], []>} : vector<2x128xf32>, vector<128x16xf32>, vector<2x16xf32> -> vector<2x16xf32>
    %78 = arith.mulf %74, %74 : vector<2x16xf32>
    %79 = arith.subf %77, %78 : vector<2x16xf32>
    %cst_73 = arith.constant 0.000000e+00 : f32
    %80 = vector.broadcast %cst_73 : f32 to vector<2x16xf32>
    %81 = arith.maximumf %79, %80 : vector<2x16xf32>
    %cst_74 = arith.constant 9.99999974E-6 : f32
    %82 = vector.broadcast %cst_74 : f32 to vector<2x16xf32>
    %83 = arith.addf %81, %82 : vector<2x16xf32>
    %84 = math.rsqrt %83 : vector<2x16xf32>
    %c0_75 = arith.constant 0 : index
    %c0_76 = arith.constant 0 : index
    %85 = vector.load %arg11[%c0_75, %c0_76] : memref<1x16xf32, #tpu.memory_space<vmem>>, vector<1x16xf32>
    %86 = vector.broadcast %85 : vector<1x16xf32> to vector<2x16xf32>
    %87 = arith.mulf %86, %84 : vector<2x16xf32>
    %c0_77 = arith.constant 0 : index
    %c0_78 = arith.constant 0 : index
    %88 = vector.load %arg12[%c0_77, %c0_78] : memref<1x16xf32, #tpu.memory_space<vmem>>, vector<1x16xf32>
    %89 = arith.mulf %74, %87 : vector<2x16xf32>
    %90 = vector.broadcast %88 : vector<1x16xf32> to vector<2x16xf32>
    %91 = arith.subf %90, %89 : vector<2x16xf32>
    %c0_79 = arith.constant 0 : index
    %c0_80 = arith.constant 0 : index
    %92 = vector.load %arg10[%c0_79, %c0_80] : memref<16x2xf32, #tpu.memory_space<vmem>>, vector<16x2xf32>
    %c0_81 = arith.constant 0 : index
    %c0_82 = arith.constant 0 : index
    %93 = vector.load %arg9[%c0_81, %c0_82] : memref<16x128xf32, #tpu.memory_space<vmem>>, vector<16x128xf32>
    %cst_83 = arith.constant dense<0.000000e+00> : vector<2x128xf32>
    %94 = tpu.matmul %87, %93, %cst_83 {dimension_numbers = #tpu.dot_dimension_numbers<[1], [0], [0], [1], [0, 0, 1, 1], [], []>} : vector<2x16xf32>, vector<16x128xf32>, vector<2x128xf32> -> vector<2x128xf32>
    %cst_84 = arith.constant dense<0.000000e+00> : vector<16x128xf32>
    %95 = tpu.matmul %92, %94, %cst_84 {dimension_numbers = #tpu.dot_dimension_numbers<[1], [0], [0], [1], [0, 0, 1, 1], [], []>} : vector<16x2xf32>, vector<2x128xf32>, vector<16x128xf32> -> vector<16x128xf32>
    %c0_85 = arith.constant 0 : index
    %c0_86 = arith.constant 0 : index
    %96 = vector.load %arg10[%c0_85, %c0_86] : memref<16x2xf32, #tpu.memory_space<vmem>>, vector<16x2xf32>
    %c0_87 = arith.constant 0 : index
    %c0_88 = arith.constant 0 : index
    %97 = vector.load %arg9[%c0_87, %c0_88] : memref<16x128xf32, #tpu.memory_space<vmem>>, vector<16x128xf32>
    %cst_89 = arith.constant dense<0.000000e+00> : vector<2x128xf32>
    %98 = tpu.matmul %91, %97, %cst_89 {dimension_numbers = #tpu.dot_dimension_numbers<[1], [0], [0], [1], [0, 0, 1, 1], [], []>} : vector<2x16xf32>, vector<16x128xf32>, vector<2x128xf32> -> vector<2x128xf32>
    %cst_90 = arith.constant dense<0.000000e+00> : vector<16x128xf32>
    %99 = tpu.matmul %96, %98, %cst_90 {dimension_numbers = #tpu.dot_dimension_numbers<[1], [0], [0], [1], [0, 0, 1, 1], [], []>} : vector<16x2xf32>, vector<2x128xf32>, vector<16x128xf32> -> vector<16x128xf32>
    %100 = arith.mulf %70, %95 : vector<16x128xf32>
    %101 = arith.addf %100, %99 : vector<16x128xf32>
    %cst_91 = arith.constant 0.000000e+00 : f32
    %102 = vector.broadcast %cst_91 : f32 to vector<16x128xf32>
    %103 = arith.cmpf ogt, %101, %102 : vector<16x128xf32>
    %cst_92 = arith.constant 2.000000e-01 : f32
    %104 = vector.broadcast %cst_92 : f32 to vector<16x128xf32>
    %105 = arith.mulf %104, %101 : vector<16x128xf32>
    %106 = arith.select %103, %101, %105 : vector<16x128xi1>, vector<16x128xf32>
    %c0_93 = arith.constant 0 : index
    %c0_94 = arith.constant 0 : index
    %c0_95 = arith.constant 0 : index
    %107 = vector.load %arg13[%c0_93, %c0_94, %c0_95] : memref<4x8x16xf32, #tpu.memory_space<vmem>>, vector<1x8x16xf32>
    %108 = vector.shape_cast %107 : vector<1x8x16xf32> to vector<8x16xf32>
    %cst_96 = arith.constant dense<0.000000e+00> : vector<8x128xf32>
    %109 = tpu.matmul %108, %106, %cst_96 {dimension_numbers = #tpu.dot_dimension_numbers<[1], [0], [0], [1], [0, 0, 1, 1], [], []>} : vector<8x16xf32>, vector<16x128xf32>, vector<8x128xf32> -> vector<8x128xf32>
    %110 = arith.truncf %109 : vector<8x128xf32> to vector<8x128xbf16>
    %c0_97 = arith.constant 0 : index
    %c0_98 = arith.constant 0 : index
    %c0_99 = arith.constant 0 : index
    %111 = vector.load %arg14[%c0_97, %c0_98, %c0_99] : memref<4x128x128xbf16, #tpu.memory_space<vmem>>, vector<1x128x128xbf16>
    %112 = vector.shape_cast %111 : vector<1x128x128xbf16> to vector<128x128xbf16>
    %cst_100 = arith.constant dense<0.000000e+00> : vector<8x128xf32>
    %113 = tpu.matmul %110, %112, %cst_100 {dimension_numbers = #tpu.dot_dimension_numbers<[1], [0], [0], [1], [0, 0, 1, 1], [], []>} : vector<8x128xbf16>, vector<128x128xbf16>, vector<8x128xf32> -> vector<8x128xf32>
    %c1_101 = arith.constant 1 : index
    %c0_102 = arith.constant 0 : index
    %c0_103 = arith.constant 0 : index
    %114 = vector.load %arg13[%c1_101, %c0_102, %c0_103] : memref<4x8x16xf32, #tpu.memory_space<vmem>>, vector<1x8x16xf32>
    %115 = vector.shape_cast %114 : vector<1x8x16xf32> to vector<8x16xf32>
    %cst_104 = arith.constant dense<0.000000e+00> : vector<8x128xf32>
    %116 = tpu.matmul %115, %106, %cst_104 {dimension_numbers = #tpu.dot_dimension_numbers<[1], [0], [0], [1], [0, 0, 1, 1], [], []>} : vector<8x16xf32>, vector<16x128xf32>, vector<8x128xf32> -> vector<8x128xf32>
    %117 = arith.truncf %116 : vector<8x128xf32> to vector<8x128xbf16>
    %c1_105 = arith.constant 1 : index
    %c0_106 = arith.constant 0 : index
    %c0_107 = arith.constant 0 : index
    %118 = vector.load %arg14[%c1_105, %c0_106, %c0_107] : memref<4x128x128xbf16, #tpu.memory_space<vmem>>, vector<1x128x128xbf16>
    %119 = vector.shape_cast %118 : vector<1x128x128xbf16> to vector<128x128xbf16>
    %cst_108 = arith.constant dense<0.000000e+00> : vector<8x128xf32>
    %120 = tpu.matmul %117, %119, %cst_108 {dimension_numbers = #tpu.dot_dimension_numbers<[1], [0], [0], [1], [0, 0, 1, 1], [], []>} : vector<8x128xbf16>, vector<128x128xbf16>, vector<8x128xf32> -> vector<8x128xf32>
    %121 = arith.addf %113, %120 : vector<8x128xf32>
    %c2_109 = arith.constant 2 : index
    %c0_110 = arith.constant 0 : index
    %c0_111 = arith.constant 0 : index
    %122 = vector.load %arg13[%c2_109, %c0_110, %c0_111] : memref<4x8x16xf32, #tpu.memory_space<vmem>>, vector<1x8x16xf32>
    %123 = vector.shape_cast %122 : vector<1x8x16xf32> to vector<8x16xf32>
    %cst_112 = arith.constant dense<0.000000e+00> : vector<8x128xf32>
    %124 = tpu.matmul %123, %106, %cst_112 {dimension_numbers = #tpu.dot_dimension_numbers<[1], [0], [0], [1], [0, 0, 1, 1], [], []>} : vector<8x16xf32>, vector<16x128xf32>, vector<8x128xf32> -> vector<8x128xf32>
    %125 = arith.truncf %124 : vector<8x128xf32> to vector<8x128xbf16>
    %c2_113 = arith.constant 2 : index
    %c0_114 = arith.constant 0 : index
    %c0_115 = arith.constant 0 : index
    %126 = vector.load %arg14[%c2_113, %c0_114, %c0_115] : memref<4x128x128xbf16, #tpu.memory_space<vmem>>, vector<1x128x128xbf16>
    %127 = vector.shape_cast %126 : vector<1x128x128xbf16> to vector<128x128xbf16>
    %cst_116 = arith.constant dense<0.000000e+00> : vector<8x128xf32>
    %128 = tpu.matmul %125, %127, %cst_116 {dimension_numbers = #tpu.dot_dimension_numbers<[1], [0], [0], [1], [0, 0, 1, 1], [], []>} : vector<8x128xbf16>, vector<128x128xbf16>, vector<8x128xf32> -> vector<8x128xf32>
    %129 = arith.addf %121, %128 : vector<8x128xf32>
    %c3_117 = arith.constant 3 : index
    %c0_118 = arith.constant 0 : index
    %c0_119 = arith.constant 0 : index
    %130 = vector.load %arg13[%c3_117, %c0_118, %c0_119] : memref<4x8x16xf32, #tpu.memory_space<vmem>>, vector<1x8x16xf32>
    %131 = vector.shape_cast %130 : vector<1x8x16xf32> to vector<8x16xf32>
    %cst_120 = arith.constant dense<0.000000e+00> : vector<8x128xf32>
    %132 = tpu.matmul %131, %106, %cst_120 {dimension_numbers = #tpu.dot_dimension_numbers<[1], [0], [0], [1], [0, 0, 1, 1], [], []>} : vector<8x16xf32>, vector<16x128xf32>, vector<8x128xf32> -> vector<8x128xf32>
    %133 = arith.truncf %132 : vector<8x128xf32> to vector<8x128xbf16>
    %c3_121 = arith.constant 3 : index
    %c0_122 = arith.constant 0 : index
    %c0_123 = arith.constant 0 : index
    %134 = vector.load %arg14[%c3_121, %c0_122, %c0_123] : memref<4x128x128xbf16, #tpu.memory_space<vmem>>, vector<1x128x128xbf16>
    %135 = vector.shape_cast %134 : vector<1x128x128xbf16> to vector<128x128xbf16>
    %cst_124 = arith.constant dense<0.000000e+00> : vector<8x128xf32>
    %136 = tpu.matmul %133, %135, %cst_124 {dimension_numbers = #tpu.dot_dimension_numbers<[1], [0], [0], [1], [0, 0, 1, 1], [], []>} : vector<8x128xbf16>, vector<128x128xbf16>, vector<8x128xf32> -> vector<8x128xf32>
    %137 = arith.addf %129, %136 : vector<8x128xf32>
    %c0_125 = arith.constant 0 : index
    %c0_126 = arith.constant 0 : index
    %138 = vector.load %arg15[%c0_125, %c0_126] : memref<2x8xf32, #tpu.memory_space<vmem>>, vector<2x8xf32>
    %c0_127 = arith.constant 0 : index
    %c0_128 = arith.constant 0 : index
    %139 = vector.load %arg16[%c0_127, %c0_128] : memref<128x32xf32, #tpu.memory_space<vmem>>, vector<128x32xf32>
    %cst_129 = arith.constant dense<0.000000e+00> : vector<2x128xf32>
    %140 = tpu.matmul %138, %137, %cst_129 {dimension_numbers = #tpu.dot_dimension_numbers<[1], [0], [0], [1], [0, 0, 1, 1], [], []>} : vector<2x8xf32>, vector<8x128xf32>, vector<2x128xf32> -> vector<2x128xf32>
    %cst_130 = arith.constant dense<0.000000e+00> : vector<2x32xf32>
    %141 = tpu.matmul %140, %139, %cst_130 {dimension_numbers = #tpu.dot_dimension_numbers<[1], [0], [0], [1], [0, 0, 1, 1], [], []>} : vector<2x128xf32>, vector<128x32xf32>, vector<2x32xf32> -> vector<2x32xf32>
    %142 = arith.mulf %137, %137 : vector<8x128xf32>
    %cst_131 = arith.constant dense<0.000000e+00> : vector<2x128xf32>
    %143 = tpu.matmul %138, %142, %cst_131 {dimension_numbers = #tpu.dot_dimension_numbers<[1], [0], [0], [1], [0, 0, 1, 1], [], []>} : vector<2x8xf32>, vector<8x128xf32>, vector<2x128xf32> -> vector<2x128xf32>
    %cst_132 = arith.constant dense<0.000000e+00> : vector<2x32xf32>
    %144 = tpu.matmul %143, %139, %cst_132 {dimension_numbers = #tpu.dot_dimension_numbers<[1], [0], [0], [1], [0, 0, 1, 1], [], []>} : vector<2x128xf32>, vector<128x32xf32>, vector<2x32xf32> -> vector<2x32xf32>
    %145 = arith.mulf %141, %141 : vector<2x32xf32>
    %146 = arith.subf %144, %145 : vector<2x32xf32>
    %cst_133 = arith.constant 0.000000e+00 : f32
    %147 = vector.broadcast %cst_133 : f32 to vector<2x32xf32>
    %148 = arith.maximumf %146, %147 : vector<2x32xf32>
    %cst_134 = arith.constant 9.99999974E-6 : f32
    %149 = vector.broadcast %cst_134 : f32 to vector<2x32xf32>
    %150 = arith.addf %148, %149 : vector<2x32xf32>
    %151 = math.rsqrt %150 : vector<2x32xf32>
    %c0_135 = arith.constant 0 : index
    %c0_136 = arith.constant 0 : index
    %152 = vector.load %arg19[%c0_135, %c0_136] : memref<1x32xf32, #tpu.memory_space<vmem>>, vector<1x32xf32>
    %153 = vector.broadcast %152 : vector<1x32xf32> to vector<2x32xf32>
    %154 = arith.mulf %153, %151 : vector<2x32xf32>
    %c0_137 = arith.constant 0 : index
    %c0_138 = arith.constant 0 : index
    %155 = vector.load %arg20[%c0_137, %c0_138] : memref<1x32xf32, #tpu.memory_space<vmem>>, vector<1x32xf32>
    %156 = arith.mulf %141, %154 : vector<2x32xf32>
    %157 = vector.broadcast %155 : vector<1x32xf32> to vector<2x32xf32>
    %158 = arith.subf %157, %156 : vector<2x32xf32>
    %c0_139 = arith.constant 0 : index
    %c0_140 = arith.constant 0 : index
    %159 = vector.load %arg18[%c0_139, %c0_140] : memref<8x2xf32, #tpu.memory_space<vmem>>, vector<8x2xf32>
    %c0_141 = arith.constant 0 : index
    %c0_142 = arith.constant 0 : index
    %160 = vector.load %arg17[%c0_141, %c0_142] : memref<32x128xf32, #tpu.memory_space<vmem>>, vector<32x128xf32>
    %cst_143 = arith.constant dense<0.000000e+00> : vector<2x128xf32>
    %161 = tpu.matmul %154, %160, %cst_143 {dimension_numbers = #tpu.dot_dimension_numbers<[1], [0], [0], [1], [0, 0, 1, 1], [], []>} : vector<2x32xf32>, vector<32x128xf32>, vector<2x128xf32> -> vector<2x128xf32>
    %cst_144 = arith.constant dense<0.000000e+00> : vector<8x128xf32>
    %162 = tpu.matmul %159, %161, %cst_144 {dimension_numbers = #tpu.dot_dimension_numbers<[1], [0], [0], [1], [0, 0, 1, 1], [], []>} : vector<8x2xf32>, vector<2x128xf32>, vector<8x128xf32> -> vector<8x128xf32>
    %c0_145 = arith.constant 0 : index
    %c0_146 = arith.constant 0 : index
    %163 = vector.load %arg18[%c0_145, %c0_146] : memref<8x2xf32, #tpu.memory_space<vmem>>, vector<8x2xf32>
    %c0_147 = arith.constant 0 : index
    %c0_148 = arith.constant 0 : index
    %164 = vector.load %arg17[%c0_147, %c0_148] : memref<32x128xf32, #tpu.memory_space<vmem>>, vector<32x128xf32>
    %cst_149 = arith.constant dense<0.000000e+00> : vector<2x128xf32>
    %165 = tpu.matmul %158, %164, %cst_149 {dimension_numbers = #tpu.dot_dimension_numbers<[1], [0], [0], [1], [0, 0, 1, 1], [], []>} : vector<2x32xf32>, vector<32x128xf32>, vector<2x128xf32> -> vector<2x128xf32>
    %cst_150 = arith.constant dense<0.000000e+00> : vector<8x128xf32>
    %166 = tpu.matmul %163, %165, %cst_150 {dimension_numbers = #tpu.dot_dimension_numbers<[1], [0], [0], [1], [0, 0, 1, 1], [], []>} : vector<8x2xf32>, vector<2x128xf32>, vector<8x128xf32> -> vector<8x128xf32>
    %167 = arith.mulf %137, %162 : vector<8x128xf32>
    %168 = arith.addf %167, %166 : vector<8x128xf32>
    %cst_151 = arith.constant 0.000000e+00 : f32
    %169 = vector.broadcast %cst_151 : f32 to vector<8x128xf32>
    %170 = arith.cmpf ogt, %168, %169 : vector<8x128xf32>
    %cst_152 = arith.constant 2.000000e-01 : f32
    %171 = vector.broadcast %cst_152 : f32 to vector<8x128xf32>
    %172 = arith.mulf %171, %168 : vector<8x128xf32>
    %173 = arith.select %170, %168, %172 : vector<8x128xi1>, vector<8x128xf32>
    %c0_153 = arith.constant 0 : index
    %c0_154 = arith.constant 0 : index
    %174 = vector.load %arg22[%c0_153, %c0_154] : memref<8x128xf32, #tpu.memory_space<vmem>>, vector<8x128xf32>
    %175 = arith.mulf %173, %174 : vector<8x128xf32>
    %cst_155 = arith.constant dense<0.000000e+00> : vector<8xf32>
    %176 = vector.multi_reduction <add>, %175, %cst_155 [1] : vector<8x128xf32> to vector<8xf32>
    %177 = vector.shape_cast %176 : vector<8xf32> to vector<8x1xf32>
    %c0_156 = arith.constant 0 : index
    %c0_157 = arith.constant 0 : index
    %178 = vector.load %arg21[%c0_156, %c0_157] : memref<2x8xf32, #tpu.memory_space<vmem>>, vector<2x8xf32>
    %cst_158 = arith.constant dense<0.000000e+00> : vector<2x1xf32>
    %179 = tpu.matmul %178, %177, %cst_158 {dimension_numbers = #tpu.dot_dimension_numbers<[1], [0], [0], [1], [0, 0, 1, 1], [], []>} : vector<2x8xf32>, vector<8x1xf32>, vector<2x1xf32> -> vector<2x1xf32>
    %c0_159 = arith.constant 0 : index
    %c0_160 = arith.constant 0 : index
    %180 = vector.load %arg23[%c0_159, %c0_160] : memref<1x1xf32, #tpu.memory_space<vmem>>, vector<1x1xf32>
    %181 = vector.broadcast %180 : vector<1x1xf32> to vector<2x1xf32>
    %182 = arith.addf %179, %181 : vector<2x1xf32>
    %c0_161 = arith.constant 0 : index
    %c0_162 = arith.constant 0 : index
    %183 = vector.load %arg24[%c0_161, %c0_162] : memref<2x1xf32, #tpu.memory_space<vmem>>, vector<2x1xf32>
    tpu.vector_store %arg24[%c0_161, %c0_162], %182 {strides = array<i32>} : memref<2x1xf32, #tpu.memory_space<vmem>>, vector<2x1xf32>,
    return
  }
  func.func @transform_0(%arg0: i32) -> (i32, i32) {
    %c0_i32 = arith.constant 0 : i32
    %c0_i32_0 = arith.constant 0 : i32
    return %arg0, %c0_i32 : i32, i32
  }
  func.func @transform_1(%arg0: i32) -> (i32, i32, i32) {
    %c0_i32 = arith.constant 0 : i32
    %c0_i32_0 = arith.constant 0 : i32
    %c0_i32_1 = arith.constant 0 : i32
    %c0_i32_2 = arith.constant 0 : i32
    return %c0_i32, %c0_i32_0, %c0_i32_1 : i32, i32, i32
  }
  func.func @transform_2(%arg0: i32) -> (i32, i32, i32) {
    %c0_i32 = arith.constant 0 : i32
    %c0_i32_0 = arith.constant 0 : i32
    %c0_i32_1 = arith.constant 0 : i32
    %c0_i32_2 = arith.constant 0 : i32
    return %c0_i32, %c0_i32_0, %c0_i32_1 : i32, i32, i32
  }
  func.func @transform_3(%arg0: i32) -> (i32, i32) {
    %c0_i32 = arith.constant 0 : i32
    %c0_i32_0 = arith.constant 0 : i32
    %c0_i32_1 = arith.constant 0 : i32
    return %c0_i32, %c0_i32_0 : i32, i32
  }
  func.func @transform_4(%arg0: i32) -> (i32, i32, i32) {
    %c0_i32 = arith.constant 0 : i32
    %c0_i32_0 = arith.constant 0 : i32
    %c0_i32_1 = arith.constant 0 : i32
    %c0_i32_2 = arith.constant 0 : i32
    return %c0_i32, %c0_i32_0, %c0_i32_1 : i32, i32, i32
  }
  func.func @transform_5(%arg0: i32) -> (i32, i32, i32) {
    %c0_i32 = arith.constant 0 : i32
    %c0_i32_0 = arith.constant 0 : i32
    %c0_i32_1 = arith.constant 0 : i32
    %c0_i32_2 = arith.constant 0 : i32
    return %c0_i32, %c0_i32_0, %c0_i32_1 : i32, i32, i32
  }
  func.func @transform_6(%arg0: i32) -> (i32, i32) {
    %c0_i32 = arith.constant 0 : i32
    %c0_i32_0 = arith.constant 0 : i32
    %c0_i32_1 = arith.constant 0 : i32
    return %c0_i32, %c0_i32_0 : i32, i32
  }
  func.func @transform_7(%arg0: i32) -> (i32, i32) {
    %c0_i32 = arith.constant 0 : i32
    %c0_i32_0 = arith.constant 0 : i32
    %c0_i32_1 = arith.constant 0 : i32
    return %c0_i32, %c0_i32_0 : i32, i32
  }
  func.func @transform_8(%arg0: i32) -> (i32, i32) {
    %c0_i32 = arith.constant 0 : i32
    %c0_i32_0 = arith.constant 0 : i32
    %c0_i32_1 = arith.constant 0 : i32
    return %c0_i32, %c0_i32_0 : i32, i32
  }
  func.func @transform_9(%arg0: i32) -> (i32, i32) {
    %c0_i32 = arith.constant 0 : i32
    %c0_i32_0 = arith.constant 0 : i32
    %c0_i32_1 = arith.constant 0 : i32
    return %c0_i32, %c0_i32_0 : i32, i32
  }
  func.func @transform_10(%arg0: i32) -> (i32, i32) {
    %c0_i32 = arith.constant 0 : i32
    %c0_i32_0 = arith.constant 0 : i32
    %c0_i32_1 = arith.constant 0 : i32
    return %c0_i32, %c0_i32_0 : i32, i32
  }
  func.func @transform_11(%arg0: i32) -> (i32, i32) {
    %c0_i32 = arith.constant 0 : i32
    %c0_i32_0 = arith.constant 0 : i32
    %c0_i32_1 = arith.constant 0 : i32
    return %c0_i32, %c0_i32_0 : i32, i32
  }
  func.func @transform_12(%arg0: i32) -> (i32, i32, i32) {
    %c0_i32 = arith.constant 0 : i32
    %c0_i32_0 = arith.constant 0 : i32
    %c0_i32_1 = arith.constant 0 : i32
    %c0_i32_2 = arith.constant 0 : i32
    return %c0_i32, %c0_i32_0, %c0_i32_1 : i32, i32, i32
  }
  func.func @transform_13(%arg0: i32) -> (i32, i32, i32) {
    %c0_i32 = arith.constant 0 : i32
    %c0_i32_0 = arith.constant 0 : i32
    %c0_i32_1 = arith.constant 0 : i32
    %c0_i32_2 = arith.constant 0 : i32
    return %c0_i32, %c0_i32_0, %c0_i32_1 : i32, i32, i32
  }
  func.func @transform_14(%arg0: i32) -> (i32, i32) {
    %c0_i32 = arith.constant 0 : i32
    %c0_i32_0 = arith.constant 0 : i32
    %c0_i32_1 = arith.constant 0 : i32
    return %c0_i32, %c0_i32_0 : i32, i32
  }
  func.func @transform_15(%arg0: i32) -> (i32, i32) {
    %c0_i32 = arith.constant 0 : i32
    %c0_i32_0 = arith.constant 0 : i32
    %c0_i32_1 = arith.constant 0 : i32
    return %c0_i32, %c0_i32_0 : i32, i32
  }
  func.func @transform_16(%arg0: i32) -> (i32, i32) {
    %c0_i32 = arith.constant 0 : i32
    %c0_i32_0 = arith.constant 0 : i32
    %c0_i32_1 = arith.constant 0 : i32
    return %c0_i32, %c0_i32_0 : i32, i32
  }
  func.func @transform_17(%arg0: i32) -> (i32, i32) {
    %c0_i32 = arith.constant 0 : i32
    %c0_i32_0 = arith.constant 0 : i32
    %c0_i32_1 = arith.constant 0 : i32
    return %c0_i32, %c0_i32_0 : i32, i32
  }
  func.func @transform_18(%arg0: i32) -> (i32, i32) {
    %c0_i32 = arith.constant 0 : i32
    %c0_i32_0 = arith.constant 0 : i32
    %c0_i32_1 = arith.constant 0 : i32
    return %c0_i32, %c0_i32_0 : i32, i32
  }
  func.func @transform_19(%arg0: i32) -> (i32, i32) {
    %c0_i32 = arith.constant 0 : i32
    %c0_i32_0 = arith.constant 0 : i32
    %c0_i32_1 = arith.constant 0 : i32
    return %c0_i32, %c0_i32_0 : i32, i32
  }
  func.func @transform_20(%arg0: i32) -> (i32, i32) {
    %c0_i32 = arith.constant 0 : i32
    %c0_i32_0 = arith.constant 0 : i32
    %c0_i32_1 = arith.constant 0 : i32
    return %c0_i32, %c0_i32_0 : i32, i32
  }
  func.func @transform_21(%arg0: i32) -> (i32, i32) {
    %c0_i32 = arith.constant 0 : i32
    %c0_i32_0 = arith.constant 0 : i32
    %c0_i32_1 = arith.constant 0 : i32
    return %c0_i32, %c0_i32_0 : i32, i32
  }
  func.func @transform_22(%arg0: i32) -> (i32, i32) {
    %c0_i32 = arith.constant 0 : i32
    %c0_i32_0 = arith.constant 0 : i32
    %c0_i32_1 = arith.constant 0 : i32
    return %c0_i32, %c0_i32_0 : i32, i32
  }
  func.func @transform_23(%arg0: i32) -> (i32, i32) {
    %c0_i32 = arith.constant 0 : i32
    %c0_i32_0 = arith.constant 0 : i32
    return %arg0, %c0_i32 : i32, i32
  }
}

</mosaic_0001>

<bundles_post_ra>
// kernel: tpu_custom_call.1
= control target key start
LH: loop header
LB: loop body
LE: loop exit
PB: predicated region body
PF: predicated region fallthrough
CT: control target
= control target key end

     0   :  { %s6506_s0 = inlined_call_operand.vmem [shape: f32[64,96], index: 0, kind: input, shape index: {}]   ;;  %s6507_s1 = inlined_call_operand.hbm [shape: f32[4,32,64], index: 1, kind: input, shape index: {}]   ;;  %s6508_s2 = inlined_call_operand.hbm [shape: bf16[4,96,128], index: 2, kind: input, shape index: {}]   ;;  %s6509_s3 = inlined_call_operand.hbm [shape: f32[1,128], index: 3, kind: input, shape index: {}]   ;;  %s6510_s4 = inlined_call_operand.hbm [shape: f32[4,16,32], index: 4, kind: input, shape index: {}]   ;;  %s6511_s5 = inlined_call_operand.vmem [shape: bf16[4,128,128], index: 5, kind: input, shape index: {}]   ;;  %s6512_s6 = inlined_call_operand.hbm [shape: f32[2,16], index: 6, kind: input, shape index: {}]   ;;  %s6513_s7 = inlined_call_operand.vmem [shape: f32[128,16], index: 7, kind: input, shape index: {}]   ;;  %s6514_s8 = inlined_call_operand.hbm [shape: f32[16,128], index: 8, kind: input, shape index: {}]   ;;  %s6515_s9 = inlined_call_operand.vmem [shape: f32[16,2], index: 9, kind: input, shape index: {}]   ;;  %s6516_s10 = inlined_call_operand.hbm [shape: f32[1,16], index: 10, kind: input, shape index: {}]   ;;  %s6517_s11 = inlined_call_operand.hbm [shape: f32[1,16], index: 11, kind: input, shape index: {}]   ;;  %s6518_s12 = inlined_call_operand.hbm [shape: f32[4,8,16], index: 12, kind: input, shape index: {}]   ;;  %s6519_s13 = inlined_call_operand.hbm [shape: bf16[4,128,128], index: 13, kind: input, shape index: {}]   ;;  %s6520_s14 = inlined_call_operand.hbm [shape: f32[2,8], index: 14, kind: input, shape index: {}]   ;;  %s6521_s15 = inlined_call_operand.vmem [shape: f32[128,32], index: 15, kind: input, shape index: {}]   ;;  %s6522_s16 = inlined_call_operand.vmem [shape: f32[32,128], index: 16, kind: input, shape index: {}]   ;;  %s6523_s17 = inlined_call_operand.vmem [shape: f32[8,2], index: 17, kind: input, shape index: {}]   ;;  %s6524_s18 = inlined_call_operand.vmem [shape: f32[1,32], index: 18, kind: input, shape index: {}]   ;;  %s6525_s19 = inlined_call_operand.vmem [shape: f32[1,32], index: 19, kind: input, shape index: {}]   ;;  %s6526_s20 = inlined_call_operand.vmem [shape: f32[2,8], index: 20, kind: input, shape index: {}]   ;;  %s6527_s21 = inlined_call_operand.vmem [shape: f32[8,128], index: 21, kind: input, shape index: {}]   ;;  %s6528_s22 = inlined_call_operand.<no memory space> [shape: f32[1,1], index: 22, kind: input, shape index: {}]   ;;  %s6529_s23 = inlined_call_operand.vmem [shape: f32[2,1], index: 23, kind: output, shape index: {}]  }
   0x1   :  { %6538 = sst [smem:[#allocation26_spill]] %s6506_s0  ;;  %v28_v0 = vstv %s6528_s22 }
   0x2   :  { %6539 = sst [smem:[#allocation27_spill]] %s6507_s1  ;;  %29 = vst [vmem:[#allocation2] sm:$0x1] %v28_v0 }
   0x3   :  { %6540 = sst [smem:[#allocation28_spill]] %s6508_s2 }
   0x4   :  { %6541 = sst [smem:[#allocation29_spill]] %s6509_s3 }
   0x5   :  { %6542 = sst [smem:[#allocation30_spill]] %s6510_s4 }
   0x6   :  { %6543 = sst [smem:[#allocation31_spill]] %s6511_s5 }
   0x7   :  { %6544 = sst [smem:[#allocation32_spill]] %s6512_s6 }
   0x8   :  { %6545 = sst [smem:[#allocation33_spill]] %s6513_s7 }
   0x9   :  { %6546 = sst [smem:[#allocation34_spill]] %s6526_s20 }
   0xa   :  { %6547 = sst [smem:[#allocation35_spill]] %s6529_s23 }
   0xb   :  { %30 = vsyncpa [#allocation4], 0 }
   0xc   :  { %31 = vsyncpa [#allocation6], 0 }
   0xd   :  { %32 = vsyncpa [#allocation9], 0 }
   0xe   :  { %33 = vsyncpa [#allocation12], 0 }
   0xf   :  { %34 = vsyncpa [#allocation15], 0 }
  0x10   :  { %35 = vsyncpa [#allocation18], 0  ;;  %s5681_s24 = smov [#allocation5]   ;;  %s6548_s26 = sld [smem:[#allocation28_spill]] }
  0x11   :  { %s55_s25 = sshll.u32 %s5681_s24, 4  ;;  %s56_s25 = int_to_ptr.vmem [resolvable:$true] %s55_s25 }
  0x16   :  { %s5427_s2 = scalar_lea.hbm %s6548_s26, 3072 }
  0x17   :  { %p5428_p0 = scmp.ne.s32.totalorder %s6548_s26, %s5427_s2  ;;  %p5431_p1 = scmp.lt.u32.totalorder %s5427_s2, %s6548_s26 }
  0x19   :  { %p5433_p2 = pnand %p5431_p1, %p5428_p0 }
  0x1b   :  { %5436 = shalt.err (!%p5433_p2)
}
  0x1c   :  { %s5437_s28 = scalar_lea.vmem %s56_s25, 3072  ;;  %p5442_p4 = scmp.lt.s32.totalorder %s56_s25, %s56_s25 }
  0x1d   :  { %p5438_p3 = scmp.ne.s32.totalorder %s56_s25, %s5437_s28  ;;  %p5443_p5 = scmp.lt.s32.totalorder %s5437_s28, %s5437_s28 }
  0x1f   :  { %p5444_p6 = por %p5443_p5, %p5442_p4 }
  0x21   :  { %p5445_p7 = pnand %p5444_p6, %p5438_p3 }
  0x23   :  { %5448 = shalt.err (!%p5445_p7)
}
  0x24   :  { %s5682_s29 = smov 64   ;;  %s5683_s3 = smov 4  }
  0x25   :  { %61 = dma.hbm_to_vmem [thread:$0]  %s6548_s26, 3072, %s56_s25, [#allocation6], %s5682_s29, %s5682_s29, %s5683_s3  }
  0x26   :  { %s5684_s30 = smov [#allocation8]   ;;  %s5685_s5 = smov [#allocation11]  }
  0x27   :  { %s77_s24 = sshll.u32 %s5684_s30, 4  ;;  %s103_s1 = sshll.u32 %s5685_s5, 4  ;;  %s78_s24 = int_to_ptr.vmem [resolvable:$true] %s77_s24  ;;  %s104_s1 = int_to_ptr.vmem [resolvable:$true] %s103_s1 }
  0x28   :  { %s6549_s27 = sld [smem:[#allocation30_spill]] }
  0x2e   :  { %s5449_s7 = scalar_lea.hbm %s6549_s27, 1024 }
  0x2f   :  { %p5450_p8 = scmp.ne.s32.totalorder %s6549_s27, %s5449_s7  ;;  %p5453_p9 = scmp.lt.u32.totalorder %s5449_s7, %s6549_s27 }
  0x31   :  { %p5455_p10 = pnand %p5453_p9, %p5450_p8 }
  0x33   :  { %5458 = shalt.err (!%p5455_p10)
}
  0x34   :  { %s5459_s25 = scalar_lea.vmem %s78_s24, 1024  ;;  %p5464_p12 = scmp.lt.s32.totalorder %s78_s24, %s78_s24 }
  0x35   :  { %p5460_p11 = scmp.ne.s32.totalorder %s78_s24, %s5459_s25  ;;  %p5465_p13 = scmp.lt.s32.totalorder %s5459_s25, %s5459_s25 }
  0x37   :  { %p5466_p0 = por %p5465_p13, %p5464_p12 }
  0x39   :  { %p5467_p1 = pnand %p5466_p0, %p5460_p11 }
  0x3b   :  { %5470 = shalt.err (!%p5467_p1)
}
  0x3c   :  { %s5686_s26 = smov 128   ;;  %s5687_s0 = smov 8  }
  0x3d   :  { %83 = dma.hbm_to_vmem [thread:$0]  %s6549_s27, 1024, %s78_s24, [#allocation9], %s5686_s26, %s5686_s26, %s5687_s0  }
  0x3e   :  { %s5471_s5 = scalar_lea.hbm %s6514_s8, 256 }
  0x3f   :  { %p5472_p2 = scmp.ne.s32.totalorder %s6514_s8, %s5471_s5  ;;  %p5475_p3 = scmp.lt.u32.totalorder %s5471_s5, %s6514_s8 }
  0x41   :  { %p5477_p4 = pnand %p5475_p3, %p5472_p2 }
  0x43   :  { %5480 = shalt.err (!%p5477_p4)
}
  0x44   :  { %s5481_s28 = scalar_lea.vmem %s104_s1, 256  ;;  %p5486_p6 = scmp.lt.s32.totalorder %s104_s1, %s104_s1 }
  0x45   :  { %p5482_p5 = scmp.ne.s32.totalorder %s104_s1, %s5481_s28  ;;  %p5487_p7 = scmp.lt.s32.totalorder %s5481_s28, %s5481_s28 }
  0x47   :  { %p5488_p8 = por %p5487_p7, %p5486_p6 }
  0x49   :  { %p5489_p9 = pnand %p5488_p8, %p5482_p5 }
  0x4b   :  { %5492 = shalt.err (!%p5489_p9)
}
  0x4c   :  { %109 = dma.hbm_to_vmem [thread:$0]  %s6514_s8, 256, %s104_s1, [#allocation12], %s5686_s26, %s5686_s26, %s5687_s0  }
  0x4d   :  { %s5688_s25 = smov [#allocation14]   ;;  %s5689_s30 = smov [#allocation17]  }
  0x4e   :  { %s128_s4 = sshll.u32 %s5688_s25, 4  ;;  %s149_s20 = sshll.u32 %s5689_s30, 4  ;;  %s129_s4 = int_to_ptr.vmem [resolvable:$true] %s128_s4  ;;  %s150_s20 = int_to_ptr.vmem [resolvable:$true] %s149_s20 }
  0x4f   :  { %s5493_s2 = scalar_lea.hbm %s6517_s11, 16 }
  0x50   :  { %p5494_p10 = scmp.ne.s32.totalorder %s6517_s11, %s5493_s2  ;;  %p5497_p11 = scmp.lt.u32.totalorder %s5493_s2, %s6517_s11 }
  0x52   :  { %p5499_p12 = pnand %p5497_p11, %p5494_p10 }
  0x54   :  { %5502 = shalt.err (!%p5499_p12)
}
  0x55   :  { %s5503_s8 = scalar_lea.vmem %s129_s4, 16  ;;  %s5507_s1 = scalar_lea.vmem %s129_s4, 32 }
  0x56   :  { %p5504_p13 = scmp.ne.s32.totalorder %s129_s4, %s5503_s8  ;;  %p5508_p0 = scmp.lt.s32.totalorder %s129_s4, %s129_s4 }
  0x57   :  { %p5509_p1 = scmp.lt.s32.totalorder %s5507_s1, %s5503_s8 }
  0x59   :  { %p5510_p2 = por %p5509_p1, %p5508_p0 }
  0x5b   :  { %p5511_p3 = pnand %p5510_p2, %p5504_p13 }
  0x5d   :  { %5514 = shalt.err (!%p5511_p3)
}
  0x5e   :  { %131 = dma.hbm_to_vmem [thread:$0]  %s6517_s11, 16, %s129_s4, [#allocation15]  }
  0x5f   :  { %s5515_s23 = scalar_lea.hbm %s6519_s13, 4096 }
  0x60   :  { %p5516_p4 = scmp.ne.s32.totalorder %s6519_s13, %s5515_s23  ;;  %p5519_p5 = scmp.lt.u32.totalorder %s5515_s23, %s6519_s13 }
  0x62   :  { %p5521_p6 = pnand %p5519_p5, %p5516_p4 }
  0x64   :  { %5524 = shalt.err (!%p5521_p6)
}
  0x65   :  { %s5525_s22 = scalar_lea.vmem %s150_s20, 4096  ;;  %p5530_p8 = scmp.lt.s32.totalorder %s150_s20, %s150_s20 }
  0x66   :  { %p5526_p7 = scmp.ne.s32.totalorder %s150_s20, %s5525_s22  ;;  %p5531_p9 = scmp.lt.s32.totalorder %s5525_s22, %s5525_s22 }
  0x68   :  { %p5532_p10 = por %p5531_p9, %p5530_p8 }
  0x6a   :  { %p5533_p11 = pnand %p5532_p10, %p5526_p7 }
  0x6c   :  { %5536 = shalt.err (!%p5533_p11)
}
  0x6d   :  { %155 = dma.hbm_to_vmem [thread:$0]  %s6519_s13, 4096, %s150_s20, [#allocation18], %s5682_s29, %s5682_s29, %s5683_s3  }
  0x6e   :  { %s5690_s28 = smov [#allocation3]   ;;  %s5691_s1 = smov [#allocation7]  }
  0x6f   :  { %s43_s8 = sshll.u32 %s5690_s28, 4  ;;  %s68_s24 = sshll.u32 %s5691_s1, 4  ;;  %s44_s8 = int_to_ptr.vmem [resolvable:$true] %s43_s8  ;;  %s69_s24 = int_to_ptr.vmem [resolvable:$true] %s68_s24 }
  0x70   :  { %s6550_s30 = sld [smem:[#allocation27_spill]] }
  0x76   :  { %s5537_s23 = scalar_lea.hbm %s6550_s30, 2048 }
  0x77   :  { %p5538_p12 = scmp.ne.s32.totalorder %s6550_s30, %s5537_s23  ;;  %p5541_p13 = scmp.lt.u32.totalorder %s5537_s23, %s6550_s30 }
  0x79   :  { %p5543_p0 = pnand %p5541_p13, %p5538_p12 }
  0x7b   :  { %5546 = shalt.err (!%p5543_p0)
}
  0x7c   :  { %s5547_s13 = scalar_lea.vmem %s44_s8, 2048  ;;  %p5552_p2 = scmp.lt.s32.totalorder %s44_s8, %s44_s8 }
  0x7d   :  { %p5548_p1 = scmp.ne.s32.totalorder %s44_s8, %s5547_s13  ;;  %p5553_p3 = scmp.lt.s32.totalorder %s5547_s13, %s5547_s13 }
  0x7f   :  { %p5554_p4 = por %p5553_p3, %p5552_p2 }
  0x81   :  { %p5555_p5 = pnand %p5554_p4, %p5548_p1 }
  0x83   :  { %5558 = shalt.err (!%p5555_p5)
}
  0x84   :  { %49 = dma.hbm_to_vmem [thread:$0]  %s6550_s30, 2048, %s44_s8, [#allocation4], %s5686_s26, %s5686_s26, %s5687_s0  }
  0x85   :  { %s6551_s11 = sld [smem:[#allocation29_spill]] }
  0x8b   :  { %s5559_s4 = scalar_lea.hbm %s6551_s11, 16 }
  0x8c   :  { %p5560_p6 = scmp.ne.s32.totalorder %s6551_s11, %s5559_s4  ;;  %p5563_p7 = scmp.lt.u32.totalorder %s5559_s4, %s6551_s11 }
  0x8e   :  { %p5565_p8 = pnand %p5563_p7, %p5560_p6 }
  0x90   :  { %5568 = shalt.err (!%p5565_p8)
}
  0x91   :  { %s5569_s23 = scalar_lea.vmem %s69_s24, 16  ;;  %s5573_s5 = scalar_lea.vmem %s69_s24, 32 }
  0x92   :  { %p5570_p9 = scmp.ne.s32.totalorder %s69_s24, %s5569_s23  ;;  %p5574_p10 = scmp.lt.s32.totalorder %s69_s24, %s69_s24 }
  0x93   :  { %p5575_p11 = scmp.lt.s32.totalorder %s5573_s5, %s5569_s23 }
  0x95   :  { %p5576_p12 = por %p5575_p11, %p5574_p10 }
  0x97   :  { %p5577_p13 = pnand %p5576_p12, %p5570_p9 }
  0x99   :  { %5580 = shalt.err (!%p5577_p13)
}
  0x9a   :  { %71 = dma.hbm_to_vmem [thread:$0]  %s6551_s11, 16, %s69_s24, [#allocation6]  }
  0x9b   :  { %s5692_s2 = smov [#allocation10]   ;;  %s5693_s7 = smov [#allocation13]  }
  0x9c   :  { %s92_s6 = sshll.u32 %s5692_s2, 4  ;;  %s118_s13 = sshll.u32 %s5693_s7, 4  ;;  %s93_s6 = int_to_ptr.vmem [resolvable:$true] %s92_s6  ;;  %s119_s13 = int_to_ptr.vmem [resolvable:$true] %s118_s13 }
  0x9d   :  { %s6552_s20 = sld [smem:[#allocation32_spill]] }
  0xa3   :  { %s5581_s22 = scalar_lea.hbm %s6552_s20, 32 }
  0xa4   :  { %p5582_p0 = scmp.ne.s32.totalorder %s6552_s20, %s5581_s22  ;;  %p5585_p1 = scmp.lt.u32.totalorder %s5581_s22, %s6552_s20 }
  0xa6   :  { %p5587_p2 = pnand %p5585_p1, %p5582_p0 }
  0xa8   :  { %5590 = shalt.err (!%p5587_p2)
}
  0xa9   :  { %s5591_s24 = scalar_lea.vmem %s93_s6, 32  ;;  %p5596_p4 = scmp.lt.s32.totalorder %s93_s6, %s93_s6 }
  0xaa   :  { %p5592_p3 = scmp.ne.s32.totalorder %s93_s6, %s5591_s24  ;;  %p5597_p5 = scmp.lt.s32.totalorder %s5591_s24, %s5591_s24 }
  0xac   :  { %p5598_p6 = por %p5597_p5, %p5596_p4 }
  0xae   :  { %p5599_p7 = pnand %p5598_p6, %p5592_p3 }
  0xb0   :  { %5602 = shalt.err (!%p5599_p7)
}
  0xb1   :  { %95 = dma.hbm_to_vmem [thread:$0]  %s6552_s20, 32, %s93_s6, [#allocation9]  }
  0xb2   :  { %s5603_s8 = scalar_lea.hbm %s6516_s10, 16 }
  0xb3   :  { %p5604_p8 = scmp.ne.s32.totalorder %s6516_s10, %s5603_s8  ;;  %p5607_p9 = scmp.lt.u32.totalorder %s5603_s8, %s6516_s10 }
  0xb5   :  { %p5609_p10 = pnand %p5607_p9, %p5604_p8 }
  0xb7   :  { %5612 = shalt.err (!%p5609_p10)
}
  0xb8   :  { %s5613_s3 = scalar_lea.vmem %s119_s13, 16  ;;  %s5617_s22 = scalar_lea.vmem %s119_s13, 32 }
  0xb9   :  { %p5614_p11 = scmp.ne.s32.totalorder %s119_s13, %s5613_s3  ;;  %p5618_p12 = scmp.lt.s32.totalorder %s119_s13, %s119_s13 }
  0xba   :  { %p5619_p13 = scmp.lt.s32.totalorder %s5617_s22, %s5613_s3 }
  0xbc   :  { %p5620_p0 = por %p5619_p13, %p5618_p12 }
  0xbe   :  { %p5621_p1 = pnand %p5620_p0, %p5614_p11 }
  0xc0   :  { %5624 = shalt.err (!%p5621_p1)
}
  0xc1   :  { %121 = dma.hbm_to_vmem [thread:$0]  %s6516_s10, 16, %s119_s13, [#allocation12]  }
  0xc2   :  { %s5694_s4 = smov [#allocation16]   ;;  %s5695_s1 = smov [#allocation19]  }
  0xc3   :  { %s137_s28 = sshll.u32 %s5694_s4, 4  ;;  %s162_s27 = sshll.u32 %s5695_s1, 4  ;;  %s138_s28 = int_to_ptr.vmem [resolvable:$true] %s137_s28  ;;  %s163_s27 = int_to_ptr.vmem [resolvable:$true] %s162_s27 }
  0xc4   :  { %s5625_s25 = scalar_lea.hbm %s6518_s12, 512 }
  0xc5   :  { %p5626_p2 = scmp.ne.s32.totalorder %s6518_s12, %s5625_s25  ;;  %p5629_p3 = scmp.lt.u32.totalorder %s5625_s25, %s6518_s12 }
  0xc7   :  { %p5631_p4 = pnand %p5629_p3, %p5626_p2 }
  0xc9   :  { %5634 = shalt.err (!%p5631_p4)
}
  0xca   :  { %s5635_s10 = scalar_lea.vmem %s138_s28, 512  ;;  %p5640_p6 = scmp.lt.s32.totalorder %s138_s28, %s138_s28 }
  0xcb   :  { %p5636_p5 = scmp.ne.s32.totalorder %s138_s28, %s5635_s10  ;;  %p5641_p7 = scmp.lt.s32.totalorder %s5635_s10, %s5635_s10 }
  0xcd   :  { %p5642_p8 = por %p5641_p7, %p5640_p6 }
  0xcf   :  { %p5643_p9 = pnand %p5642_p8, %p5636_p5 }
  0xd1   :  { %5646 = shalt.err (!%p5643_p9)
}
  0xd2   :  { %143 = dma.hbm_to_vmem [thread:$0]  %s6518_s12, 512, %s138_s28, [#allocation15], %s5686_s26, %s5686_s26, %s5687_s0  }
  0xd3   :  { %s5647_s3 = scalar_lea.hbm %s6520_s14, 32 }
  0xd4   :  { %p5648_p10 = scmp.ne.s32.totalorder %s6520_s14, %s5647_s3  ;;  %p5651_p11 = scmp.lt.u32.totalorder %s5647_s3, %s6520_s14 }
  0xd6   :  { %p5653_p12 = pnand %p5651_p11, %p5648_p10 }
  0xd8   :  { %5656 = shalt.err (!%p5653_p12)
}
  0xd9   :  { %s5657_s1 = scalar_lea.vmem %s163_s27, 32  ;;  %p5662_p0 = scmp.lt.s32.totalorder %s163_s27, %s163_s27 }
  0xda   :  { %p5658_p13 = scmp.ne.s32.totalorder %s163_s27, %s5657_s1  ;;  %p5663_p1 = scmp.lt.s32.totalorder %s5657_s1, %s5657_s1 }
  0xdc   :  { %p5664_p2 = por %p5663_p1, %p5662_p0 }
  0xde   :  { %p5665_p3 = pnand %p5664_p2, %p5658_p13 }
  0xe0   :  { %5668 = shalt.err (!%p5665_p3)
}
  0xe1   :  { %165 = dma.hbm_to_vmem [thread:$0]  %s6520_s14, 32, %s163_s27, [#allocation18]  }
  0xe2   :  { %5669 = dma.done.wait [#allocation4], 2048  }
  0xe3   :  { %5670 = vsyncadd [#allocation4], 4294965248 }
  0xe4   :  { %5671 = dma.done.wait [#allocation6], 3088  }
  0xe5   :  { %5672 = vsyncadd [#allocation6], 4294964208 }
  0xe6   :  { %5673 = dma.done.wait [#allocation9], 1056  }
  0xe7   :  { %5674 = vsyncadd [#allocation9], 4294966240 }
  0xe8   :  { %5675 = dma.done.wait [#allocation12], 272  }
  0xe9   :  { %5676 = vsyncadd [#allocation12], 4294967024 }
  0xea   :  { %5677 = dma.done.wait [#allocation15], 528  }
  0xeb   :  { %5678 = vsyncadd [#allocation15], 4294966768 }
  0xec   :  { %5679 = dma.done.wait [#allocation18], 4128  }
  0xed   :  { %5680 = vsyncadd [#allocation18], 4294963168  ;;  %s6553_s24 = sld [smem:[#allocation26_spill]]  ;;  %vm228_vm0 = vcmask 523264   ;;  %v341_v9 = vld [vmem:[#allocation3 + $0x20] sm:$0xff]  ;;  %v5335_v15 = vld [vmem:[#allocation5 + $0x30] sm:$0xff]  }
  0xee   :  { %4482 = vmatprep.mubr.msk.f32.mxu1 %vm228_vm0, %v341_v9  ;;  %v224_v10 = vld [vmem:[#allocation3] sm:$0xff]  ;;  %v342_v16 = vld [vmem:[#allocation3 + $0x28] sm:$0xff]  ;;  %v343_v17 = vld [vmem:[#allocation3 + $0x30] sm:$0xff]  ;;  %vm493_vm1 = vcmask 785408   ;;  %vm1089_vm2 = vcmask 261120   ;;  %s6554_s20 = sld [smem:[#allocation31_spill]] }
  0xef   :  { %4460 = vmatprep.mubr.msk.f32.mxu0 %vm228_vm0, %v224_v10  ;;  %v225_v18 = vld [vmem:[#allocation3 + $0x8] sm:$0xff]  ;;  %v226_v19 = vld [vmem:[#allocation3 + $0x10] sm:$0xff]  ;;  %v5336_v20 = vld [vmem:[#allocation5 + $0x38] sm:$0xff]   ;;  %vm5697_vm7 = vmmov 0   ;;  %vm1871_vm8 = vcmask 130048   ;;  %vm2256_vm9 = vcmask 15360  }
  0xf0   :  { %v344_v21 = vld [vmem:[#allocation3 + $0x38] sm:$0xff]  ;;  %v641_v23 = vld [vmem:[#allocation3 + $0x40] sm:$0xff]  ;;  %v5338_v25 = vld [vmem:[#allocation5 + $0x48] sm:$0xff]   ;;  %vm2263_vm10 = vcmask 1041408   ;;  %vm3244_vm13 = vcmask 64512   ;;  %s6556_s1 = sld [smem:[#allocation34_spill]] }
  0xf1   :  { %v227_v22 = vld [vmem:[#allocation3 + $0x18] sm:$0xff]  ;;  %v5337_v24 = vld [vmem:[#allocation5 + $0x40] sm:$0xff]   ;;  %v5339_v26 = vld [vmem:[#allocation5 + $0x50] sm:$0xff]   ;;  %vm3941_vm15 = vcmask 1024   ;;  %s6557_s26 = sld [smem:[#allocation35_spill]] }
  0xf2   :  { %v642_v27 = vld [vmem:[#allocation3 + $0x48] sm:$0xff]  ;;  %v643_v28 = vld [vmem:[#allocation3 + $0x50] sm:$0xff]  ;;  %v644_v29 = vld [vmem:[#allocation3 + $0x58] sm:$0xff] }
  0xf3   :  { %v216_v1 = vld [vmem:[%s6553_s24] sm:$0xff]  ;;  %v217_v2 = vld [vmem:[%s6553_s24 + $0x8] sm:$0xff]  ;;  %v218_v3 = vld [vmem:[%s6553_s24 + $0x10] sm:$0xff] }
  0xf4   :  { %v5981_v4 = vpack.c.bf16 %v217_v2, %v216_v1  ;;  %v219_v5 = vld [vmem:[%s6553_s24 + $0x18] sm:$0xff]  ;;  %v220_v7 = vld [vmem:[%s6553_s24 + $0x20] sm:$0xff]  ;;  %v221_v8 = vld [vmem:[%s6553_s24 + $0x28] sm:$0xff] }
  0xf5   :  { %v5986_v6 = vpack.c.bf16 %v219_v5, %v218_v3  ;;  %v5999_v11 = vpack.c.bf16 %v221_v8, %v220_v7  ;;  %v222_v12 = vld [vmem:[%s6553_s24 + $0x30] sm:$0xff]  ;;  %v223_v13 = vld [vmem:[%s6553_s24 + $0x38] sm:$0xff]  ;;  %v853_v30 = vld [vmem:[#allocation3 + $0x60] sm:$0xff] }
  0xf6   :  { %5070 = vmatprep.subr.bf16.mxu1 %v5981_v4  ;;  %5054 = vmatprep.subr.bf16.mxu0 %v5981_v4  ;;  %v5065_v14 = vpack.c.bf16 %v223_v13, %v222_v12  ;;  %v854_v31 = vld [vmem:[#allocation3 + $0x68] sm:$0xff]  ;;  %v855_v32 = vld [vmem:[#allocation3 + $0x70] sm:$0xff]  ;;  %v856_v33 = vld [vmem:[#allocation3 + $0x78] sm:$0xff] }
  0xf7   :  { %5072 = vmatpush3.bf16.msra.mxu1 %v5981_v4  ;;  %5056 = vmatpush3.bf16.msra.mxu0 %v5981_v4  ;;  %v5340_v34 = vld [vmem:[#allocation5 + $0x58] sm:$0xff]   ;;  %v5341_v35 = vld [vmem:[#allocation5] sm:$0xff]   ;;  %v5342_v46 = vld [vmem:[#allocation5 + $0x8] sm:$0xff]  }
  0xf8   :  { %5074 = vmatprep.subr.bf16.mxu1 %v5986_v6  ;;  %5058 = vmatprep.subr.bf16.mxu0 %v5986_v6  ;;  %v5343_v49 = vld [vmem:[#allocation5 + $0x10] sm:$0xff]   ;;  %v5344_v50 = vld [vmem:[#allocation5 + $0x18] sm:$0xff]   ;;  %v5345_v52 = vld [vmem:[#allocation5 + $0x20] sm:$0xff]  }
  0xf9   :  { %v5346_v56 = vld [vmem:[#allocation5 + $0x28] sm:$0xff]   ;;  %v5347_v59 = vld [vmem:[#allocation5 + $0x60] sm:$0xff]   ;;  %v5349_v62 = vld [vmem:[#allocation5 + $0x70] sm:$0xff]  }
  0xfa   :  { %v5348_v60 = vld [vmem:[#allocation5 + $0x68] sm:$0xff]   ;;  %v5350_v2 = vld [vmem:[#allocation5 + $0x78] sm:$0xff]   ;;  %v5351_v5 = vld [vmem:[#allocation5 + $0x80] sm:$0xff]  }
  0xfb   :  { %5076 = vmatpush3.bf16.msra.mxu1 %v5986_v6  ;;  %5060 = vmatpush3.bf16.msra.mxu0 %v5986_v6  ;;  %v5353_v7 = vld [vmem:[#allocation5 + $0x90] sm:$0xff]   ;;  %v5354_v8 = vld [vmem:[#allocation5 + $0x98] sm:$0xff]   ;;  %v5355_v9 = vld [vmem:[#allocation5 + $0xa0] sm:$0xff]  }
  0xfc   :  { %5078 = vmatprep.subr.bf16.mxu1 %v5999_v11  ;;  %5062 = vmatprep.subr.bf16.mxu0 %v5999_v11  ;;  %v5356_v10 = vld [vmem:[#allocation5 + $0xa8] sm:$0xff]   ;;  %v5358_v12 = vld [vmem:[#allocation5 + $0xb8] sm:$0xff]  }
  0xfd   :  { %v1189_v13 = vld [vmem:[#allocation8 + $0x10] sm:$0xff] }
  0xff   :  { %5080 = vmatpush3.bf16.msra.mxu1 %v5999_v11  ;;  %5064 = vmatpush3.bf16.msra.mxu0 %v5999_v11 }
 0x100   :  { %5082 = vmatprep.subr.bf16.mxu1 %v5065_v14  ;;  %5066 = vmatprep.subr.bf16.mxu0 %v5065_v14 }
 0x103   :  { %5084 = vmatpush3.bf16.msra.mxu1 %v5065_v14  ;;  %5068 = vmatpush3.bf16.msra.mxu0 %v5065_v14 }
 0x104   :  { %5086 = vmatprep.subr.bf16.mxu1 %v5981_v4  ;;  %4488 = vmatprep.subr.bf16.mxu0 %v5335_v15 }
 0x106   :  { %4483 = vmatmul.mubr.msk.f32.vlgmr.msra.gmra.mrb[0].mxu1 %vm228_vm0, %v342_v16  ;;  %4461 = vmatmul.mubr.msk.f32.vlgmr.msra.gmra.mrb[0].mxu0 %vm228_vm0, %v225_v18 }
 0x107   :  { %4485 = vmatprep.mubr.msk.f32.mxu1 %vm228_vm0, %v343_v17  ;;  %4463 = vmatprep.mubr.msk.f32.mxu0 %vm228_vm0, %v226_v19 }
 0x108   :  { %5088 = vmatpush3.bf16.msra.mxu1 %v5981_v4  ;;  %4489 = vmatpush3.bf16.msra.mxu0 %v5335_v15  ;;  %v4001_v15 = vld [vmem:[#allocation7] ss:$0 sm:$0xff] }
 0x109   :  { %5090 = vmatprep.subr.bf16.mxu1 %v5986_v6  ;;  %4490 = vmatprep.subr.bf16.mxu0 %v5336_v20 }
 0x10a   :  { %4486 = vmatmul.mubr.msk.f32.gmra.mrb[2].mxu1 %vm228_vm0, %v344_v21  ;;  %4464 = vmatmul.mubr.msk.f32.gmra.mrb[2].mxu0 %vm228_vm0, %v227_v22 }
 0x10b   :  { %4536 = vmatprep.mubr.msk.f32.mxu1 %vm228_vm0, %v641_v23 }
 0x10c   :  { %5092 = vmatpush3.bf16.msra.mxu1 %v5986_v6  ;;  %4491 = vmatpush3.bf16.msra.mxu0 %v5336_v20 }
 0x10d   :  { %5094 = vmatprep.subr.bf16.mxu1 %v5999_v11  ;;  %4492 = vmatprep.subr.bf16.mxu0 %v5337_v24 }
 0x110   :  { %5096 = vmatpush3.bf16.msra.mxu1 %v5999_v11  ;;  %4493 = vmatpush3.bf16.msra.mxu0 %v5337_v24 }
 0x111   :  { %5098 = vmatprep.subr.bf16.mxu1 %v5065_v14  ;;  %4494 = vmatprep.subr.bf16.mxu0 %v5338_v25 }
 0x114   :  { %5100 = vmatpush3.bf16.msra.mxu1 %v5065_v14  ;;  %4495 = vmatpush3.bf16.msra.mxu0 %v5338_v25 }
 0x115   :  { %5102 = vmatprep.subr.bf16.mxu1 %v5981_v4  ;;  %4496 = vmatprep.subr.bf16.mxu0 %v5339_v26 }
 0x117   :  { %4537 = vmatmul.mubr.msk.f32.vlgmr.msra.gmra.mrb[4].mxu1 %vm228_vm0, %v642_v27 }
 0x118   :  { %4539 = vmatprep.mubr.msk.f32.mxu1 %vm228_vm0, %v643_v28  ;;  %5104 = vmatpush3.bf16.msra.mxu1 %v5981_v4 }
 0x119   :  { %5106 = vmatprep.subr.bf16.mxu1 %v5986_v6  ;;  %4497 = vmatpush3.bf16.msra.mxu0 %v5339_v26 }
 0x11a   :  { %4498 = vmatprep.subr.bf16.mxu0 %v5340_v34 }
 0x11b   :  { %4540 = vmatmul.mubr.msk.f32.gmra.mrb[6].mxu1 %vm228_vm0, %v644_v29 }
 0x11c   :  { %5108 = vmatpush3.bf16.msra.mxu1 %v5986_v6  ;;  %4574 = vmatprep.mubr.msk.f32.mxu1 %vm228_vm0, %v853_v30  ;;  %v5352_v6 = vld [vmem:[#allocation5 + $0x88] sm:$0xff]  }
 0x11d   :  { %5110 = vmatprep.subr.bf16.mxu1 %v5999_v11  ;;  %4499 = vmatpush3.bf16.msra.mxu0 %v5340_v34  ;;  %v1190_v34 = vld [vmem:[#allocation8 + $0x18] sm:$0xff] }
 0x11e   :  { %4504 = vmatprep.subr.bf16.mxu0 %v5341_v35 }
 0x120   :  { %5112 = vmatpush3.bf16.msra.mxu1 %v5999_v11  ;;  %v5357_v11 = vld [vmem:[#allocation5 + $0xb0] sm:$0xff]  }
 0x121   :  { %5114 = vmatprep.subr.bf16.mxu1 %v5065_v14 }
 0x124   :  { %5116 = vmatpush3.bf16.msra.mxu1 %v5065_v14  ;;  %v1087_v14 = vld [vmem:[#allocation8] sm:$0xff] }
 0x127   :  { %4575 = vmatmul.mubr.msk.f32.vlgmr.msra.gmra.mrb[8].mxu1 %vm228_vm0, %v854_v31 }
 0x128   :  { %4577 = vmatprep.mubr.msk.f32.mxu1 %vm228_vm0, %v855_v32 }
 0x12b   :  { %4578 = vmatmul.mubr.msk.f32.gmra.mrb[10].mxu1 %vm228_vm0, %v856_v33 }
 0x12c   :  { %4615 = vmatprep.mubr.msk.f32.mxu1 %vm1089_vm2, %v1189_v13  ;;  %v5383_v13 = vld [vmem:[%s6554_s20 + $0xc0] sm:$0xff]  }
 0x1d9   :  { %v4484_v36 = vpop.f32.mrb[0].mxu1  ;;  %v4462_v38 = vpop.f32.mrb[0].mxu0 }
 0x1da   :  { %v423_v37 = vpop.f32.mrb[1].mxu1  ;;  %v307_v40 = vpop.f32.mrb[1].mxu0 }
 0x1db   :  { %v442_v39 = vpack.c.bf16 %v4484_v36, %v423_v37  ;;  %v326_v41 = vpack.c.bf16 %v4462_v38, %v307_v40  ;;  %v1469_v36 = vld [vmem:[#allocation8 + $0x20] sm:$0xff]  ;;  %v5696_v37 = vmov 0.0   ;;  %v1470_v40 = vld [vmem:[#allocation8 + $0x28] sm:$0xff] }
 0x1dc   :  { %v5359_v38 = vld [vmem:[%s6554_s20 + $0x40] sm:$0xff]  }
 0x1dd   :  { %v4487_v42 = vpop.f32.mrb[2].mxu1  ;;  %4500 = vmatprep.mubr.msk.bf16.mxu0 %vm493_vm1, %v442_v39  ;;  %v4465_v44 = vpop.f32.mrb[2].mxu0  ;;  %v5360_v39 = vld [vmem:[%s6554_s20 + $0x48] sm:$0xff]  }
 0x1de   :  { %v433_v43 = vpop.f32.mrb[3].mxu1  ;;  %v317_v47 = vpop.f32.mrb[3].mxu0 }
 0x1df   :  { %v443_v45 = vpack.c.bf16 %v4487_v42, %v433_v43  ;;  %v327_v48 = vpack.c.bf16 %v4465_v44, %v317_v47  ;;  %v5361_v42 = vld [vmem:[%s6554_s20 + $0x50] sm:$0xff]   ;;  %v5362_v43 = vld [vmem:[%s6554_s20 + $0x58] sm:$0xff]  }
 0x1e0   :  { %v1663_v44 = vld [vmem:[#allocation8 + $0x38] sm:$0xff]  ;;  %v5365_v47 = vld [vmem:[%s6554_s20 + $0x70] sm:$0xff]  }
 0x1e1   :  { %4501 = vmatmul.mubr.msk.bf16.vlgmr.msra.gmra.mrb[4].mxu0 %vm493_vm1, %v443_v45  ;;  %v5363_v45 = vld [vmem:[%s6554_s20 + $0x60] sm:$0xff]  }
 0x1e2   :  { %4505 = vmatpush3.bf16.msra.mxu0 %v5341_v35  ;;  %4516 = vmatprep.mubr.msk.bf16.mxu0 %vm493_vm1, %v326_v41  ;;  %v1088_v35 = vld [vmem:[#allocation8 + $0x8] sm:$0xff]  ;;  %v1662_v41 = vld [vmem:[#allocation8 + $0x30] sm:$0xff] }
 0x1e3   :  { %4506 = vmatprep.subr.bf16.mxu0 %v5342_v46 }
 0x1e6   :  { %4507 = vmatpush3.bf16.msra.mxu0 %v5342_v46  ;;  %v5364_v46 = vld [vmem:[%s6554_s20 + $0x68] sm:$0xff]  }
 0x1e7   :  { %4508 = vmatprep.subr.bf16.mxu0 %v5343_v49 }
 0x1ea   :  { %4509 = vmatpush3.bf16.msra.mxu0 %v5343_v49  ;;  %v4538_v51 = vpop.f32.mrb[4].mxu1 }
 0x1eb   :  { %4510 = vmatprep.subr.bf16.mxu0 %v5344_v50  ;;  %v723_v53 = vpop.f32.mrb[5].mxu1 }
 0x1ec   :  { %v742_v54 = vpack.c.bf16 %v4538_v51, %v723_v53 }
 0x1ee   :  { %4511 = vmatpush3.bf16.msra.mxu0 %v5344_v50  ;;  %v4541_v55 = vpop.f32.mrb[6].mxu1 }
 0x1ef   :  { %4512 = vmatprep.subr.bf16.mxu0 %v5345_v52  ;;  %v733_v57 = vpop.f32.mrb[7].mxu1 }
 0x1f0   :  { %v743_v58 = vpack.c.bf16 %v4541_v55, %v733_v57 }
 0x1f2   :  { %4513 = vmatpush3.bf16.msra.mxu0 %v5345_v52  ;;  %v5367_v52 = vld [vmem:[%s6554_s20] sm:$0xff]  }
 0x1f3   :  { %4514 = vmatprep.subr.bf16.mxu0 %v5346_v56 }
 0x1f6   :  { %4515 = vmatpush3.bf16.msra.mxu0 %v5346_v56  ;;  %v5368_v56 = vld [vmem:[%s6554_s20 + $0x8] sm:$0xff]  }
 0x1f7   :  { %4542 = vmatprep.subr.bf16.mxu0 %v5347_v59 }
 0x1f9   :  { %4517 = vmatmul.mubr.msk.bf16.vlgmr.msra.gmra.mrb[4].mxu0 %vm493_vm1, %v327_v48  ;;  %v5366_v48 = vld [vmem:[%s6554_s20 + $0x78] sm:$0xff]  }
 0x1fa   :  { %4543 = vmatpush3.bf16.msra.mxu0 %v5347_v59  ;;  %4554 = vmatprep.mubr.msk.bf16.mxu0 %vm493_vm1, %v742_v54  ;;  %v4576_v61 = vpop.f32.mrb[8].mxu1 }
 0x1fb   :  { %4544 = vmatprep.subr.bf16.mxu0 %v5348_v60  ;;  %v935_v63 = vpop.f32.mrb[9].mxu1 }
 0x1fc   :  { %v954_v0 = vpack.c.bf16 %v4576_v61, %v935_v63  ;;  %v5370_v61 = vld [vmem:[%s6554_s20 + $0x18] sm:$0xff]   ;;  %v5371_v63 = vld [vmem:[%s6554_s20 + $0x20] sm:$0xff]  }
 0x1fe   :  { %4545 = vmatpush3.bf16.msra.mxu0 %v5348_v60  ;;  %v4579_v1 = vpop.f32.mrb[10].mxu1 }
 0x1ff   :  { %4546 = vmatprep.subr.bf16.mxu0 %v5349_v62  ;;  %v945_v3 = vpop.f32.mrb[11].mxu1 }
 0x200   :  { %v955_v4 = vpack.c.bf16 %v4579_v1, %v945_v3  ;;  %v5373_v3 = vld [vmem:[%s6554_s20 + $0x30] sm:$0xff]  }
 0x202   :  { %4547 = vmatpush3.bf16.msra.mxu0 %v5349_v62 }
 0x203   :  { %4548 = vmatprep.subr.bf16.mxu0 %v5350_v2 }
 0x206   :  { %4549 = vmatpush3.bf16.msra.mxu0 %v5350_v2  ;;  %v5372_v2 = vld [vmem:[%s6554_s20 + $0x28] sm:$0xff]  }
 0x207   :  { %4550 = vmatprep.subr.bf16.mxu0 %v5351_v5 }
 0x20a   :  { %4551 = vmatpush3.bf16.msra.mxu0 %v5351_v5  ;;  %v5375_v5 = vld [vmem:[%s6554_s20 + $0x80] sm:$0xff]  }
 0x20b   :  { %4552 = vmatprep.subr.bf16.mxu0 %v5352_v6 }
 0x20e   :  { %4553 = vmatpush3.bf16.msra.mxu0 %v5352_v6  ;;  %v5376_v6 = vld [vmem:[%s6554_s20 + $0x88] sm:$0xff]  }
 0x20f   :  { %4580 = vmatprep.subr.bf16.mxu0 %v5353_v7 }
 0x211   :  { %4555 = vmatmul.mubr.msk.bf16.vlgmr.msra.gmra.mrb[4].mxu0 %vm493_vm1, %v743_v58  ;;  %v5369_v58 = vld [vmem:[%s6554_s20 + $0x10] sm:$0xff]  }
 0x212   :  { %4581 = vmatpush3.bf16.msra.mxu0 %v5353_v7  ;;  %4592 = vmatprep.mubr.msk.bf16.mxu0 %vm493_vm1, %v954_v0  ;;  %v5377_v7 = vld [vmem:[%s6554_s20 + $0x90] sm:$0xff]  }
 0x213   :  { %4582 = vmatprep.subr.bf16.mxu0 %v5354_v8 }
 0x216   :  { %4583 = vmatpush3.bf16.msra.mxu0 %v5354_v8  ;;  %v5378_v8 = vld [vmem:[%s6554_s20 + $0x98] sm:$0xff]  }
 0x217   :  { %4584 = vmatprep.subr.bf16.mxu0 %v5355_v9 }
 0x21a   :  { %4585 = vmatpush3.bf16.msra.mxu0 %v5355_v9  ;;  %v5379_v9 = vld [vmem:[%s6554_s20 + $0xa0] sm:$0xff]  }
 0x21b   :  { %4586 = vmatprep.subr.bf16.mxu0 %v5356_v10 }
 0x21e   :  { %4587 = vmatpush3.bf16.msra.mxu0 %v5356_v10  ;;  %v5380_v10 = vld [vmem:[%s6554_s20 + $0xa8] sm:$0xff]  }
 0x21f   :  { %4588 = vmatprep.subr.bf16.mxu0 %v5357_v11 }
 0x222   :  { %4589 = vmatpush3.bf16.msra.mxu0 %v5357_v11  ;;  %v5381_v11 = vld [vmem:[%s6554_s20 + $0xb0] sm:$0xff]  }
 0x223   :  { %4590 = vmatprep.subr.bf16.mxu0 %v5358_v12 }
 0x226   :  { %4591 = vmatpush3.bf16.msra.mxu0 %v5358_v12  ;;  %v5382_v12 = vld [vmem:[%s6554_s20 + $0xb8] sm:$0xff]  }
 0x229   :  { %4593 = vmatmul.mubr.msk.bf16.vlgmr.msra.gmra.mrb[4].mxu0 %vm493_vm1, %v955_v4  ;;  %v5374_v4 = vld [vmem:[%s6554_s20 + $0x38] sm:$0xff]  }
 0x22a   :  { %4604 = vmatprep.mubr.msk.f32.mxu0 %vm1089_vm2, %v1087_v14  ;;  %v5384_v14 = vld [vmem:[%s6554_s20 + $0xc8] sm:$0xff]  }
 0x2fc   :  { %v4594_v16 = vpop.f32.mrb[4].mxu0 }
 0x2fd   :  { %v1073_v17 = vadd.f32 %v4594_v16, %v4001_v15  ;;  %v1045_v18 = vpop.f32.mrb[5].mxu0  ;;  %v5386_v16 = vld [vmem:[%s6554_s20 + $0xd8] sm:$0xff]  }
 0x2fe   :  { %v1071_v19 = vadd.f32 %v4001_v15, %v1045_v18  ;;  %v4595_v20 = vpop.f32.mrb[6].mxu0  ;;  %v5388_v18 = vld [vmem:[%s6554_s20 + $0xe8] sm:$0xff]  }
 0x2ff   :  { %v1081_v21 = vmul.f32 0.2, %v1073_v17  ;;  %v1074_v22 = vadd.f32 %v4595_v20, %v4001_v15  ;;  %v1048_v23 = vpop.f32.mrb[7].mxu0  ;;  %vm1077_vm3 = vcmp.gt.f32.partialorder %v1073_v17, 0.0  ;;  %v5390_v20 = vld [vmem:[%s6554_s20 + $0xf8] sm:$0xff]  }
 0x300   :  { %v1079_v24 = vmul.f32 0.2, %v1071_v19  ;;  %v1072_v25 = vadd.f32 %v4001_v15, %v1048_v23  ;;  %vm1075_vm4 = vcmp.gt.f32.partialorder %v1071_v19, 0.0  ;;  %v5385_v15 = vld [vmem:[%s6554_s20 + $0xd0] sm:$0xff]  }
 0x301   :  { %vm1078_vm5 = vcmp.gt.f32.partialorder %v1074_v22, 0.0  ;;  %v1082_v26 = vmul.f32 0.2, %v1074_v22  ;;  %v1085_v28 = vsel %vm1077_vm3, %v1073_v17, %v1081_v21  ;;  %v5387_v17 = vld [vmem:[%s6554_s20 + $0xe0] sm:$0xff]   ;;  %v5698_v21 = vmov 0.0|0.0  }
 0x302   :  { %vm1076_vm6 = vcmp.gt.f32.partialorder %v1072_v25, 0.0  ;;  %v1080_v27 = vmul.f32 0.2, %v1072_v25  ;;  %v1083_v30 = vsel %vm1075_vm4, %v1071_v19, %v1079_v24  ;;  %v5389_v19 = vld [vmem:[%s6554_s20 + $0xf0] sm:$0xff]   ;;  %s6555_s20 = sld [smem:[#allocation33_spill]] }
 0x303   :  { %v1086_v29 = vsel %vm1078_vm5, %v1074_v22, %v1082_v26 }
 0x304   :  { %v5121_v31 = vpack.c.bf16 %v1086_v29, %v1085_v28  ;;  %v1084_v32 = vsel %vm1076_vm6, %v1072_v25, %v1080_v27 }
 0x305   :  { %v5117_v33 = vpack.c.bf16 %v1084_v32, %v1083_v30  ;;  %v1854_v32 = vld [vmem:[#allocation10] sm:$0x3] }
 0x307   :  { %5118 = vmatprep.subr.bf16.mxu0 %v5117_v33  ;;  %5126 = vmatprep.subr.bf16.mxu1 %v5117_v33 }
 0x308   :  { %5120 = vmatpush3.bf16.msra.mxu0 %v5117_v33  ;;  %5128 = vmatpush3.bf16.msra.mxu1 %v5117_v33  ;;  %v1855_v25 = vld [vmem:[%s6555_s20] sm:$0xff]  ;;  %v1856_v26 = vld [vmem:[%s6555_s20 + $0x8] sm:$0xff] }
 0x309   :  { %5122 = vmatprep.subr.bf16.mxu0 %v5121_v31  ;;  %5130 = vmatprep.subr.bf16.mxu1 %v5121_v31 }
 0x30c   :  { %5124 = vmatpush3.bf16.msra.mxu0 %v5121_v31  ;;  %5132 = vmatpush3.bf16.msra.mxu1 %v5121_v31 }
 0x30d   :  { %5134 = vmatprep.subr.bf16.mxu0 %v5117_v33  ;;  %4618 = vmatprep.subr.bf16.mxu1 %v5696_v37 }
 0x30f   :  { %4616 = vmatmul.mubr.msk.f32.vlgmr.msra.gmra.mrb[12].mxu1 %vm1089_vm2, %v1190_v34  ;;  %4605 = vmatmul.mubr.msk.f32.vlgmr.msra.gmra.mrb[8].mxu0 %vm1089_vm2, %v1088_v35  ;;  %v1857_v34 = vld [vmem:[%s6555_s20 + $0x10] sm:$0xff]  ;;  %v1858_v35 = vld [vmem:[%s6555_s20 + $0x18] sm:$0xff] }
 0x310   :  { %5136 = vmatpush3.bf16.msra.mxu0 %v5117_v33  ;;  %4666 = vmatprep.mubr.msk.f32.mxu0 %vm1089_vm2, %v1469_v36  ;;  %v5156_v36 = vpack.c.bf16 %v1858_v35, %v1857_v34  ;;  %v2595_v35 = vld [vmem:[#allocation16 + $0x8] sm:$0xff] }
 0x311   :  { %5138 = vmatprep.subr.bf16.mxu0 %v5121_v31  ;;  %4619 = vmatpush3.bf16.msra.mxu1 %v5359_v38  ;;  %v1859_v38 = vld [vmem:[%s6555_s20 + $0x20] sm:$0xff] }
 0x312   :  { %4620 = vmatprep.subr.bf16.mxu1 %v5696_v37  ;;  %4634 = vmatprep.mubr.msk.bf16.mxu1 %vm5697_vm7, %v5696_v37 }
 0x314   :  { %5140 = vmatpush3.bf16.msra.mxu0 %v5121_v31 }
 0x315   :  { %5142 = vmatprep.subr.bf16.mxu0 %v5117_v33  ;;  %4621 = vmatpush3.bf16.msra.mxu1 %v5360_v39  ;;  %v1860_v39 = vld [vmem:[%s6555_s20 + $0x28] sm:$0xff] }
 0x316   :  { %4622 = vmatprep.subr.bf16.mxu1 %v5696_v37 }
 0x317   :  { %4667 = vmatmul.mubr.msk.f32.vlgmr.msra.gmra.mrb[10].mxu0 %vm1089_vm2, %v1470_v40  ;;  %v5159_v40 = vpack.c.bf16 %v1860_v39, %v1859_v38  ;;  %v5392_v38 = vld [vmem:[#allocation17 + $0x48] sm:$0xff]   ;;  %v3046_v39 = vld [vmem:[#allocation16 + $0x18] sm:$0xff] }
 0x318   :  { %5144 = vmatpush3.bf16.msra.mxu0 %v5117_v33  ;;  %4697 = vmatprep.mubr.msk.f32.mxu0 %vm1089_vm2, %v1662_v41  ;;  %v5153_v33 = vpack.c.bf16 %v1856_v26, %v1855_v25  ;;  %v1861_v41 = vld [vmem:[%s6555_s20 + $0x30] sm:$0xff] }
 0x319   :  { %5146 = vmatprep.subr.bf16.mxu0 %v5121_v31  ;;  %4623 = vmatpush3.bf16.msra.mxu1 %v5361_v42  ;;  %v1862_v42 = vld [vmem:[%s6555_s20 + $0x38] sm:$0xff] }
 0x31a   :  { %4624 = vmatprep.subr.bf16.mxu1 %v5696_v37 }
 0x31c   :  { %5148 = vmatpush3.bf16.msra.mxu0 %v5121_v31 }
 0x31d   :  { %4625 = vmatpush3.bf16.msra.mxu1 %v5362_v43  ;;  %5149 = vmatprep.subr.bf16.mxu0 %v5698_v21  ;;  %v5162_v43 = vpack.c.bf16 %v1862_v42, %v1861_v41  ;;  %v5394_v41 = vld [vmem:[#allocation17 + $0x58] sm:$0xff]   ;;  %v5395_v42 = vld [vmem:[#allocation17 + $0x60] sm:$0xff]  }
 0x31e   :  { %4626 = vmatprep.subr.bf16.mxu1 %v5696_v37 }
 0x31f   :  { %4698 = vmatmul.mubr.msk.f32.vlgmr.msra.gmra.mrb[12].mxu0 %vm1089_vm2, %v1663_v44  ;;  %v1863_v44 = vld [vmem:[%s6555_s20 + $0x40] sm:$0xff] }
 0x320   :  { %4724 = vmatprep.mubr.msk.f32.mxu0 %vm5697_vm7, %v5696_v37 }
 0x321   :  { %4627 = vmatpush3.bf16.msra.mxu1 %v5363_v45  ;;  %v1864_v45 = vld [vmem:[%s6555_s20 + $0x48] sm:$0xff] }
 0x322   :  { %4628 = vmatprep.subr.bf16.mxu1 %v5696_v37 }
 0x325   :  { %4629 = vmatpush3.bf16.msra.mxu1 %v5364_v46  ;;  %v5165_v46 = vpack.c.bf16 %v1864_v45, %v1863_v44  ;;  %v5397_v44 = vld [vmem:[#allocation17 + $0x70] sm:$0xff]   ;;  %v5398_v45 = vld [vmem:[#allocation17 + $0x78] sm:$0xff]  }
 0x326   :  { %4630 = vmatprep.subr.bf16.mxu1 %v5696_v37 }
 0x329   :  { %4631 = vmatpush3.bf16.msra.mxu1 %v5365_v47  ;;  %v1865_v47 = vld [vmem:[%s6555_s20 + $0x50] sm:$0xff] }
 0x32a   :  { %4632 = vmatprep.subr.bf16.mxu1 %v5696_v37 }
 0x32d   :  { %4633 = vmatpush3.bf16.msra.mxu1 %v5366_v48  ;;  %v1866_v48 = vld [vmem:[%s6555_s20 + $0x58] sm:$0xff] }
 0x32e   :  { %4638 = vmatprep.subr.bf16.mxu1 %v5696_v37 }
 0x3e2   :  { %v4617_v49 = vpop.f32.mrb[12].mxu1  ;;  %v4606_v50 = vpop.f32.mrb[8].mxu0 }
 0x3e3   :  { %v1263_v51 = vpop.f32.mrb[13].mxu1  ;;  %v1162_v53 = vpop.f32.mrb[9].mxu0 }
 0x3e4   :  { %v1272_v54 = vpack.c.bf16 %v4617_v49, %v1263_v51  ;;  %v1171_v55 = vpack.c.bf16 %v4606_v50, %v1162_v53  ;;  %v5168_v49 = vpack.c.bf16 %v1866_v48, %v1865_v47  ;;  %v1867_v50 = vld [vmem:[%s6555_s20 + $0x60] sm:$0xff]  ;;  %v1868_v51 = vld [vmem:[%s6555_s20 + $0x68] sm:$0xff]  ;;  %v1869_v53 = vld [vmem:[%s6555_s20 + $0x70] sm:$0xff] }
 0x3e5   :  { %v5399_v47 = vld [vmem:[#allocation17] sm:$0xff]  }
 0x3e6   :  { %4635 = vmatmul.mubr.bf16.vlgmr.msra.gmra.mrb[16].mxu1 %v1272_v54  ;;  %v1870_v54 = vld [vmem:[%s6555_s20 + $0x78] sm:$0xff] }
 0x3e7   :  { %4639 = vmatpush3.bf16.msra.mxu1 %v5367_v52  ;;  %4654 = vmatprep.mubr.msk.bf16.mxu1 %vm5697_vm7, %v5696_v37  ;;  %v5171_v52 = vpack.c.bf16 %v1868_v51, %v1867_v50 }
 0x3e8   :  { %4640 = vmatprep.subr.bf16.mxu1 %v5696_v37 }
 0x3ea   :  { %v4668_v57 = vpop.f32.mrb[10].mxu0 }
 0x3eb   :  { %4641 = vmatpush3.bf16.msra.mxu1 %v5368_v56  ;;  %v1543_v59 = vpop.f32.mrb[11].mxu0 }
 0x3ec   :  { %4642 = vmatprep.subr.bf16.mxu1 %v5696_v37  ;;  %v1552_v60 = vpack.c.bf16 %v4668_v57, %v1543_v59 }
 0x3ef   :  { %4643 = vmatpush3.bf16.msra.mxu1 %v5369_v58 }
 0x3f0   :  { %4644 = vmatprep.subr.bf16.mxu1 %v5696_v37 }
 0x3f2   :  { %v6112_v62 = vpop.f32.mrb[12].mxu0 }
 0x3f3   :  { %4645 = vmatpush3.bf16.msra.mxu1 %v5370_v61  ;;  %v6117_v0 = vpop.f32.mrb[13].mxu0 }
 0x3f4   :  { %4646 = vmatprep.subr.bf16.mxu1 %v5696_v37  ;;  %v1745_v1 = vpack.c.bf16 %v6112_v62, %v6117_v0  ;;  %v2181_v62 = vld [vmem:[#allocation11] sm:$0xff] }
 0x3f7   :  { %4647 = vmatpush3.bf16.msra.mxu1 %v5371_v63  ;;  %v2182_v63 = vld [vmem:[#allocation11 + $0x8] sm:$0xff] }
 0x3f8   :  { %4648 = vmatprep.subr.bf16.mxu1 %v5696_v37  ;;  %v5204_v0 = vpack.c.bf16 %v2182_v63, %v2181_v62  ;;  %v5406_v62 = vld [vmem:[#allocation17 + $0x38] sm:$0xff]  }
 0x3fb   :  { %4649 = vmatpush3.bf16.msra.mxu1 %v5372_v2 }
 0x3fc   :  { %4650 = vmatprep.subr.bf16.mxu1 %v5696_v37 }
 0x3ff   :  { %4651 = vmatpush3.bf16.msra.mxu1 %v5373_v3 }
 0x400   :  { %4652 = vmatprep.subr.bf16.mxu1 %v5696_v37 }
 0x403   :  { %4653 = vmatpush3.bf16.msra.mxu1 %v5374_v4 }
 0x404   :  { %4669 = vmatprep.subr.bf16.mxu1 %v5696_v37 }
 0x406   :  { %4655 = vmatmul.mubr.bf16.vlgmr.msra.gmra.mrb[16].mxu1 %v1171_v55  ;;  %v5174_v55 = vpack.c.bf16 %v1870_v54, %v1869_v53 }
 0x407   :  { %4670 = vmatpush3.bf16.msra.mxu1 %v5375_v5  ;;  %4685 = vmatprep.mubr.msk.bf16.mxu1 %vm5697_vm7, %v5696_v37 }
 0x408   :  { %4671 = vmatprep.subr.bf16.mxu1 %v5696_v37 }
 0x40b   :  { %4672 = vmatpush3.bf16.msra.mxu1 %v5376_v6 }
 0x40c   :  { %4673 = vmatprep.subr.bf16.mxu1 %v5696_v37 }
 0x40f   :  { %4674 = vmatpush3.bf16.msra.mxu1 %v5377_v7  ;;  %v4092_v7 = vld [vmem:[#allocation13] ss:$0 sm:$0xff] }
 0x410   :  { %4675 = vmatprep.subr.bf16.mxu1 %v5696_v37 }
 0x413   :  { %4676 = vmatpush3.bf16.msra.mxu1 %v5378_v8 }
 0x414   :  { %4677 = vmatprep.subr.bf16.mxu1 %v5696_v37 }
 0x417   :  { %4678 = vmatpush3.bf16.msra.mxu1 %v5379_v9 }
 0x418   :  { %4679 = vmatprep.subr.bf16.mxu1 %v5696_v37 }
 0x41b   :  { %4680 = vmatpush3.bf16.msra.mxu1 %v5380_v10  ;;  %v4093_v10 = vld [vmem:[#allocation14] ss:$0 sm:$0xff] }
 0x41c   :  { %4681 = vmatprep.subr.bf16.mxu1 %v5696_v37 }
 0x41f   :  { %4682 = vmatpush3.bf16.msra.mxu1 %v5381_v11 }
 0x420   :  { %4683 = vmatprep.subr.bf16.mxu1 %v5696_v37 }
 0x423   :  { %4684 = vmatpush3.bf16.msra.mxu1 %v5382_v12 }
 0x424   :  { %4700 = vmatprep.subr.bf16.mxu1 %v5696_v37 }
 0x426   :  { %4686 = vmatmul.mubr.bf16.vlgmr.msra.gmra.mrb[16].mxu1 %v1552_v60 }
 0x427   :  { %4701 = vmatpush3.bf16.msra.mxu1 %v5383_v13  ;;  %4716 = vmatprep.mubr.msk.bf16.mxu1 %vm5697_vm7, %v5696_v37  ;;  %v2179_v13 = vld [vmem:[%s6515_s9] sm:$0xff] }
 0x428   :  { %4702 = vmatprep.subr.bf16.mxu1 %v5696_v37 }
 0x42b   :  { %4703 = vmatpush3.bf16.msra.mxu1 %v5384_v14 }
 0x42c   :  { %4704 = vmatprep.subr.bf16.mxu1 %v5696_v37 }
 0x42f   :  { %4705 = vmatpush3.bf16.msra.mxu1 %v5385_v15  ;;  %v2180_v15 = vld [vmem:[%s6515_s9 + $0x8] sm:$0xff] }
 0x430   :  { %4706 = vmatprep.subr.bf16.mxu1 %v5696_v37 }
 0x433   :  { %4707 = vmatpush3.bf16.msra.mxu1 %v5386_v16 }
 0x434   :  { %4708 = vmatprep.subr.bf16.mxu1 %v5696_v37 }
 0x437   :  { %4709 = vmatpush3.bf16.msra.mxu1 %v5387_v17 }
 0x438   :  { %4710 = vmatprep.subr.bf16.mxu1 %v5696_v37 }
 0x43b   :  { %4711 = vmatpush3.bf16.msra.mxu1 %v5388_v18 }
 0x43c   :  { %4712 = vmatprep.subr.bf16.mxu1 %v5696_v37 }
 0x43f   :  { %4713 = vmatpush3.bf16.msra.mxu1 %v5389_v19 }
 0x440   :  { %4714 = vmatprep.subr.bf16.mxu1 %v5696_v37 }
 0x443   :  { %4715 = vmatpush3.bf16.msra.mxu1 %v5390_v20 }
 0x444   :  { %5203 = vmatprep.subr.bf16.mxu1 %v5698_v21 }
 0x446   :  { %4717 = vmatmul.mubr.bf16.vlgmr.msra.gmra.mrb[16].mxu1 %v1745_v1 }
 0x447   :  { %4808 = vmatprep.mubr.msk.f32.mxu1 %vm5697_vm7, %v5696_v37  ;;  %5205 = vmatpush3.bf16.msra.mxu1 %v5204_v0 }
 0x448   :  { %5206 = vmatprep.subr.bf16.mxu1 %v5698_v21 }
 0x519   :  { %v6206_v22 = vpop.f32.mrb[16].mxu1 }
 0x51a   :  { %v4718_v23 = vpop.f32.mrb[17].mxu1  ;;  %v2015_v27 = vmul.f32 %v6206_v22, %v6206_v22 }
 0x51b   :  { %v6208_v24 = vpop.f32.mrb[18].mxu1 }
 0x51c   :  { %v5150_v28 = vpack.c.bf16 %v6208_v24, %v6206_v22  ;;  %v2016_v29 = vmul.f32 %v6208_v24, %v6208_v24  ;;  %v4719_v30 = vpop.f32.mrb[19].mxu1 }
 0x51e   :  { %v5177_v31 = vpack.c.bf16 %v2016_v29, %v2015_v27  ;;  %5151 = vmatpush3.bf16.msra.mxu0 %v5150_v28 }
 0x51f   :  { %5152 = vmatprep.subr.bf16.mxu0 %v5698_v21 }
 0x521   :  { %4725 = vmatmul.mubr.msk.f32.vlgmr.msra.gmra.mrb[14].mxu0 %vm1871_vm8, %v1854_v32 }
 0x522   :  { %5154 = vmatpush3.bf16.msra.mxu0 %v5153_v33  ;;  %4759 = vmatprep.mubr.msk.f32.mxu0 %vm5697_vm7, %v5696_v37 }
 0x523   :  { %5155 = vmatprep.subr.bf16.mxu0 %v5698_v21 }
 0x526   :  { %5157 = vmatpush3.bf16.msra.mxu0 %v5156_v36 }
 0x527   :  { %5158 = vmatprep.subr.bf16.mxu0 %v5698_v21 }
 0x52a   :  { %5160 = vmatpush3.bf16.msra.mxu0 %v5159_v40 }
 0x52b   :  { %5161 = vmatprep.subr.bf16.mxu0 %v5698_v21 }
 0x52e   :  { %5163 = vmatpush3.bf16.msra.mxu0 %v5162_v43 }
 0x52f   :  { %5164 = vmatprep.subr.bf16.mxu0 %v5698_v21 }
 0x532   :  { %5166 = vmatpush3.bf16.msra.mxu0 %v5165_v46 }
 0x533   :  { %5167 = vmatprep.subr.bf16.mxu0 %v5698_v21 }
 0x536   :  { %5169 = vmatpush3.bf16.msra.mxu0 %v5168_v49 }
 0x537   :  { %5170 = vmatprep.subr.bf16.mxu0 %v5698_v21 }
 0x53a   :  { %5172 = vmatpush3.bf16.msra.mxu0 %v5171_v52 }
 0x53b   :  { %5173 = vmatprep.subr.bf16.mxu0 %v5698_v21 }
 0x53e   :  { %5175 = vmatpush3.bf16.msra.mxu0 %v5174_v55 }
 0x53f   :  { %5176 = vmatprep.subr.bf16.mxu0 %v5698_v21 }
 0x5f4   :  { %v1941_v56 = vpop.f32.mrb[14].mxu0 }
 0x5f5   :  { %v4726_v57 = vpop.f32.mrb[15].mxu0  ;;  %4760 = vmatmul.mubr.f32.vlgmr.msra.gmra.mrb[16].mxu0 %v1941_v56 }
 0x5f6   :  { %5178 = vmatpush3.bf16.msra.mxu0 %v5177_v31  ;;  %4766 = vmatprep.mubr.msk.f32.mxu0 %vm5697_vm7, %v5696_v37 }
 0x5f7   :  { %5179 = vmatprep.subr.bf16.mxu0 %v5698_v21 }
 0x5f9   :  { %4767 = vmatmul.mubr.msk.f32.vlgmr.msra.gmra.mrb[18].mxu0 %vm1871_vm8, %v1854_v32 }
 0x5fa   :  { %5181 = vmatpush3.bf16.msra.mxu0 %v5153_v33  ;;  %4801 = vmatprep.mubr.msk.f32.mxu0 %vm5697_vm7, %v5696_v37 }
 0x5fb   :  { %5182 = vmatprep.subr.bf16.mxu0 %v5698_v21 }
 0x5fe   :  { %5184 = vmatpush3.bf16.msra.mxu0 %v5156_v36  ;;  %v2503_v36 = vld [vmem:[#allocation16] sm:$0xff] }
 0x5ff   :  { %5185 = vmatprep.subr.bf16.mxu0 %v5698_v21 }
 0x602   :  { %5187 = vmatpush3.bf16.msra.mxu0 %v5159_v40  ;;  %v5393_v40 = vld [vmem:[#allocation17 + $0x50] sm:$0xff]  }
 0x603   :  { %5188 = vmatprep.subr.bf16.mxu0 %v5698_v21 }
 0x606   :  { %5190 = vmatpush3.bf16.msra.mxu0 %v5162_v43  ;;  %v5396_v43 = vld [vmem:[#allocation17 + $0x68] sm:$0xff]  }
 0x607   :  { %5191 = vmatprep.subr.bf16.mxu0 %v5698_v21 }
 0x60a   :  { %5193 = vmatpush3.bf16.msra.mxu0 %v5165_v46 }
 0x60b   :  { %5194 = vmatprep.subr.bf16.mxu0 %v5698_v21 }
 0x60e   :  { %5196 = vmatpush3.bf16.msra.mxu0 %v5168_v49 }
 0x60f   :  { %5197 = vmatprep.subr.bf16.mxu0 %v5698_v21 }
 0x612   :  { %5199 = vmatpush3.bf16.msra.mxu0 %v5171_v52  ;;  %v5400_v52 = vld [vmem:[#allocation17 + $0x8] sm:$0xff]  }
 0x613   :  { %5200 = vmatprep.subr.bf16.mxu0 %v5698_v21 }
 0x616   :  { %5202 = vmatpush3.bf16.msra.mxu0 %v5174_v55  ;;  %v5401_v55 = vld [vmem:[#allocation17 + $0x10] sm:$0xff]  }
 0x6c8   :  { %v2011_v58 = vpop.f32.mrb[16].mxu0 }
 0x6c9   :  { %v4761_v59 = vpop.f32.mrb[17].mxu0  ;;  %v2157_v1 = vmul.f32 %v2011_v58, %v2011_v58 }
 0x6ca   :  { %v5403_v59 = vld [vmem:[#allocation17 + $0x20] sm:$0xff]  }
 0x6cc   :  { %v2083_v60 = vpop.f32.mrb[18].mxu0 }
 0x6cd   :  { %v4768_v61 = vpop.f32.mrb[19].mxu0  ;;  %4802 = vmatmul.mubr.f32.vlgmr.msra.gmra.mrb[20].mxu0 %v2083_v60  ;;  %v5404_v60 = vld [vmem:[#allocation17 + $0x28] sm:$0xff]  }
 0x6ce   :  { %4813 = vmatprep.mubr.msk.f32.mxu0 %vm2256_vm9, %v2179_v13  ;;  %v5405_v61 = vld [vmem:[#allocation17 + $0x30] sm:$0xff]  }
 0x7a0   :  { %v2153_v2 = vpop.f32.mrb[20].mxu0 }
 0x7a1   :  { %v2158_v3 = vsub.f32 %v2153_v2, %v2157_v1  ;;  %v4803_v4 = vpop.f32.mrb[21].mxu0  ;;  %v5408_v1 = vld [vmem:[#allocation17 + $0x88] sm:$0xff]   ;;  %v5409_v2 = vld [vmem:[#allocation17 + $0x90] sm:$0xff]  }
 0x7a2   :  { %v5411_v4 = vld [vmem:[#allocation17 + $0xa0] sm:$0xff]  }
 0x7a3   :  { %v2159_v5 = vmax.f32 %v2158_v3, 0.0  ;;  %v5410_v3 = vld [vmem:[#allocation17 + $0x98] sm:$0xff]  }
 0x7a5   :  { %v2160_v6 = vadd.f32 1e-05, %v2159_v5  ;;  %v5412_v5 = vld [vmem:[#allocation17 + $0xa8] sm:$0xff]  }
 0x7a7   :  { %5423 = vrsqrt.f32 %v2160_v6  ;;  %v5413_v6 = vld [vmem:[#allocation17 + $0xb0] sm:$0xff]  }
 0x7b1   :  { %v5424_v8 = vpop.eup %5423 }
 0x7b2   :  { %v2169_v9 = vmul.f32 %v5424_v8, %v4092_v7  ;;  %v5414_v7 = vld [vmem:[#allocation17 + $0xb8] sm:$0xff]  }
 0x7b4   :  { %4809 = vmatmul.mubr.msk.f32.vlgmr.msra.gmra.mrb[14].mxu1 %vm1871_vm8, %v2169_v9  ;;  %v2171_v11 = vmul.f32 %v2169_v9, %v2011_v58  ;;  %v5402_v58 = vld [vmem:[#allocation17 + $0x18] sm:$0xff]   ;;  %v5415_v9 = vld [vmem:[#allocation17 + $0xc0] sm:$0xff]  }
 0x7b5   :  { %5208 = vmatpush3.bf16.msra.mxu1 %v5204_v0  ;;  %4820 = vmatprep.mubr.msk.f32.mxu1 %vm5697_vm7, %v5696_v37  ;;  %v5407_v0 = vld [vmem:[#allocation17 + $0x80] sm:$0xff]  }
 0x7b6   :  { %v2178_v12 = vsub.f32 %v4093_v10, %v2171_v11  ;;  %5209 = vmatprep.subr.bf16.mxu1 %v5698_v21  ;;  %v5416_v10 = vld [vmem:[#allocation17 + $0xc8] sm:$0xff]   ;;  %v5417_v11 = vld [vmem:[#allocation17 + $0xd0] sm:$0xff]  }
 0x7b8   :  { %4821 = vmatmul.mubr.msk.f32.vlgmr.msra.gmra.mrb[20].mxu1 %vm1871_vm8, %v2178_v12  ;;  %v5418_v12 = vld [vmem:[#allocation17 + $0xd8] sm:$0xff]  }
 0x7b9   :  { %4832 = vmatprep.mubr.msk.f32.mxu1 %vm5697_vm7, %v5696_v37 }
 0x887   :  { %v2252_v14 = vpop.f32.mrb[14].mxu1 }
 0x888   :  { %v4810_v16 = vpop.f32.mrb[15].mxu1  ;;  %4811 = vmatprep.subr.msk.mxu0 %vm2263_vm10, %v2252_v14 }
 0x889   :  { %4812 = vmatpush3.msk.msra.mxu0 %vm2263_vm10, %v2252_v14  ;;  %v5420_v14 = vld [vmem:[#allocation17 + $0xe8] sm:$0xff]   ;;  %v5422_v16 = vld [vmem:[#allocation17 + $0xf8] sm:$0xff]  }
 0x88a   :  { %4814 = vmatmul.mubr.msk.f32.vlgmr.msra.gmra.mrb[22].mxu0 %vm2256_vm9, %v2180_v15 }
 0x88b   :  { %v2411_v17 = vpop.f32.mrb[20].mxu1  ;;  %4825 = vmatprep.mubr.msk.f32.mxu0 %vm2256_vm9, %v2179_v13  ;;  %v5419_v13 = vld [vmem:[#allocation17 + $0xe0] sm:$0xff]  }
 0x88c   :  { %v4822_v18 = vpop.f32.mrb[21].mxu1  ;;  %4823 = vmatprep.subr.msk.mxu0 %vm2263_vm10, %v2411_v17 }
 0x88d   :  { %4824 = vmatpush3.msk.msra.mxu0 %vm2263_vm10, %v2411_v17  ;;  %v3228_v18 = vld [vmem:[%s6521_s15] sm:$0xff] }
 0x88e   :  { %4826 = vmatmul.mubr.msk.f32.vlgmr.msra.gmra.mrb[24].mxu0 %vm2256_vm9, %v2180_v15  ;;  %5212 = vmatprep.subr.bf16.mxu0 %v5698_v21  ;;  %v5421_v15 = vld [vmem:[#allocation17 + $0xf0] sm:$0xff]  }
 0x88f   :  { %4839 = vmatprep.mubr.msk.f32.mxu0 %vm5697_vm7, %v5696_v37 }
 0x95d   :  { %v4815_v19 = vpop.f32.mrb[22].mxu0 }
 0x95e   :  { %v2494_v20 = vmul.f32 %v4815_v19, %v6208_v24  ;;  %v2333_v23 = vpop.f32.mrb[23].mxu0  ;;  %v2864_v24 = vld [vmem:[#allocation16 + $0x10] sm:$0xff] }
 0x95f   :  { %v2493_v25 = vmul.f32 %v2333_v23, %v6206_v22  ;;  %v5391_v22 = vld [vmem:[#allocation17 + $0x40] sm:$0xff]   ;;  %v3229_v19 = vld [vmem:[%s6521_s15 + $0x8] sm:$0xff] }
 0x960   :  { %v5222_v23 = vpack.c.bf16 %v3229_v19, %v3228_v18 }
 0x961   :  { %v4827_v26 = vpop.f32.mrb[24].mxu0 }
 0x962   :  { %v2496_v27 = vadd.f32 %v4827_v26, %v2494_v20  ;;  %v2484_v28 = vpop.f32.mrb[25].mxu0  ;;  %v3227_v20 = vld [vmem:[#allocation19] sm:$0x3]  ;;  %v3230_v26 = vld [vmem:[%s6521_s15 + $0x10] sm:$0xff] }
 0x963   :  { %v2495_v29 = vadd.f32 %v2493_v25, %v2484_v28 }
 0x964   :  { %vm2498_vm11 = vcmp.gt.f32.partialorder %v2496_v27, 0.0  ;;  %v2500_v30 = vmul.f32 0.2, %v2496_v27 }
 0x965   :  { %vm2497_vm12 = vcmp.gt.f32.partialorder %v2495_v29, 0.0  ;;  %v2499_v31 = vmul.f32 0.2, %v2495_v29 }
 0x966   :  { %v2502_v32 = vsel %vm2498_vm11, %v2496_v27, %v2500_v30  ;;  %v3231_v27 = vld [vmem:[%s6521_s15 + $0x18] sm:$0xff] }
 0x967   :  { %v2501_v33 = vsel %vm2497_vm12, %v2495_v29, %v2499_v31  ;;  %v5225_v31 = vpack.c.bf16 %v3231_v27, %v3230_v26  ;;  %v3860_v27 = vld [vmem:[%s6556_s1] sm:$0x3] }
 0x968   :  { %v5210_v34 = vpack.c.bf16 %v2502_v32, %v2501_v33  ;;  %v3232_v32 = vld [vmem:[%s6521_s15 + $0x20] sm:$0xff]  ;;  %v3233_v33 = vld [vmem:[%s6521_s15 + $0x28] sm:$0xff] }
 0x96a   :  { %5211 = vmatpush3.bf16.msra.mxu1 %v5210_v34  ;;  %5214 = vmatpush3.bf16.msra.mxu0 %v5210_v34 }
 0x96b   :  { %5215 = vmatprep.subr.bf16.mxu0 %v5698_v21  ;;  %4842 = vmatprep.subr.bf16.mxu1 %v5696_v37 }
 0x96d   :  { %4840 = vmatmul.mubr.msk.f32.vlgmr.msra.gmra.mrb[26].mxu0 %vm1871_vm8, %v2595_v35  ;;  %4833 = vmatmul.mubr.msk.f32.vlgmr.msra.gmra.mrb[22].mxu1 %vm1871_vm8, %v2503_v36  ;;  %v3234_v35 = vld [vmem:[%s6521_s15 + $0x30] sm:$0xff]  ;;  %v3235_v36 = vld [vmem:[%s6521_s15 + $0x38] sm:$0xff] }
 0x96e   :  { %5217 = vmatpush3.bf16.msra.mxu0 %v5210_v34  ;;  %4886 = vmatprep.mubr.msk.f32.mxu0 %vm5697_vm7, %v5696_v37 }
 0x96f   :  { %5218 = vmatprep.subr.bf16.mxu0 %v5698_v21  ;;  %4843 = vmatpush3.bf16.msra.mxu1 %v5391_v22  ;;  %v5231_v22 = vpack.c.bf16 %v3235_v36, %v3234_v35 }
 0x970   :  { %4844 = vmatprep.subr.bf16.mxu1 %v5696_v37  ;;  %4858 = vmatprep.mubr.msk.bf16.mxu1 %vm5697_vm7, %v5696_v37 }
 0x971   :  { %4887 = vmatmul.mubr.msk.f32.vlgmr.msra.gmra.mrb[28].mxu0 %vm1871_vm8, %v2864_v24  ;;  %v3236_v24 = vld [vmem:[%s6521_s15 + $0x40] sm:$0xff] }
 0x972   :  { %5220 = vmatpush3.bf16.msra.mxu0 %v5210_v34  ;;  %4913 = vmatprep.mubr.msk.f32.mxu0 %vm5697_vm7, %v5696_v37  ;;  %v5228_v34 = vpack.c.bf16 %v3233_v33, %v3232_v32 }
 0x973   :  { %4845 = vmatpush3.bf16.msra.mxu1 %v5392_v38  ;;  %4936 = vmatprep.subr.mxu0 %v5696_v37  ;;  %v3237_v38 = vld [vmem:[%s6521_s15 + $0x48] sm:$0xff] }
 0x974   :  { %4846 = vmatprep.subr.bf16.mxu1 %v5696_v37 }
 0x975   :  { %4914 = vmatmul.mubr.msk.f32.vlgmr.msra.gmra.mrb[30].mxu0 %vm1871_vm8, %v3046_v39  ;;  %v5234_v39 = vpack.c.bf16 %v3237_v38, %v3236_v24 }
 0x976   :  { %4938 = vmatprep.mubr.msk.f32.mxu0 %vm5697_vm7, %v5696_v37 }
 0x977   :  { %4847 = vmatpush3.bf16.msra.mxu1 %v5393_v40  ;;  %v3238_v40 = vld [vmem:[%s6521_s15 + $0x50] sm:$0xff] }
 0x978   :  { %4848 = vmatprep.subr.bf16.mxu1 %v5696_v37 }
 0x97b   :  { %4849 = vmatpush3.bf16.msra.mxu1 %v5394_v41  ;;  %v3239_v41 = vld [vmem:[%s6521_s15 + $0x58] sm:$0xff] }
 0x97c   :  { %4850 = vmatprep.subr.bf16.mxu1 %v5696_v37 }
 0x97f   :  { %4851 = vmatpush3.bf16.msra.mxu1 %v5395_v42  ;;  %v5237_v42 = vpack.c.bf16 %v3239_v41, %v3238_v40 }
 0x980   :  { %4852 = vmatprep.subr.bf16.mxu1 %v5696_v37 }
 0x983   :  { %4853 = vmatpush3.bf16.msra.mxu1 %v5396_v43  ;;  %v3240_v43 = vld [vmem:[%s6521_s15 + $0x60] sm:$0xff] }
 0x984   :  { %4854 = vmatprep.subr.bf16.mxu1 %v5696_v37 }
 0x987   :  { %4855 = vmatpush3.bf16.msra.mxu1 %v5397_v44  ;;  %v3241_v44 = vld [vmem:[%s6521_s15 + $0x68] sm:$0xff] }
 0x988   :  { %4856 = vmatprep.subr.bf16.mxu1 %v5696_v37 }
 0x98b   :  { %4857 = vmatpush3.bf16.msra.mxu1 %v5398_v45  ;;  %v5240_v45 = vpack.c.bf16 %v3241_v44, %v3240_v43 }
 0x98c   :  { %4862 = vmatprep.subr.bf16.mxu1 %v5696_v37 }
 0xa40   :  { %v2665_v46 = vpop.f32.mrb[26].mxu0  ;;  %v2573_v48 = vpop.f32.mrb[22].mxu1 }
 0xa41   :  { %v2669_v49 = vpack.c.bf16 %v2665_v46, %v2665_v46  ;;  %v4841_v50 = vpop.f32.mrb[27].mxu0  ;;  %v4834_v51 = vpop.f32.mrb[23].mxu1  ;;  %v2577_v63 = vpack.c.bf16 %v2573_v48, %v2573_v48  ;;  %v3242_v46 = vld [vmem:[%s6521_s15 + $0x70] sm:$0xff] }
 0xa43   :  { %4859 = vmatmul.mubr.bf16.vlgmr.msra.gmra.mrb[24].mxu1 %v2669_v49 }
 0xa44   :  { %4863 = vmatpush3.bf16.msra.mxu1 %v5399_v47  ;;  %4878 = vmatprep.mubr.msk.bf16.mxu1 %vm5697_vm7, %v5696_v37  ;;  %v2934_v53 = vpop.f32.mrb[28].mxu0  ;;  %v3243_v47 = vld [vmem:[%s6521_s15 + $0x78] sm:$0xff] }
 0xa45   :  { %4864 = vmatprep.subr.bf16.mxu1 %v5696_v37  ;;  %v4888_v54 = vpop.f32.mrb[29].mxu0  ;;  %v2938_v8 = vpack.c.bf16 %v2934_v53, %v2934_v53  ;;  %v5243_v48 = vpack.c.bf16 %v3243_v47, %v3242_v46 }
 0xa48   :  { %4865 = vmatpush3.bf16.msra.mxu1 %v5400_v52  ;;  %v6343_v56 = vpop.f32.mrb[30].mxu0 }
 0xa49   :  { %4866 = vmatprep.subr.bf16.mxu1 %v5696_v37  ;;  %v4915_v57 = vpop.f32.mrb[31].mxu0  ;;  %v3120_v17 = vpack.c.bf16 %v6343_v56, %v6343_v56  ;;  %v3552_v56 = vld [vmem:[%s6522_s16] sm:$0xff] }
 0xa4a   :  { %v3553_v57 = vld [vmem:[%s6522_s16 + $0x8] sm:$0xff] }
 0xa4c   :  { %4867 = vmatpush3.bf16.msra.mxu1 %v5401_v55 }
 0xa4d   :  { %4868 = vmatprep.subr.bf16.mxu1 %v5696_v37 }
 0xa50   :  { %4869 = vmatpush3.bf16.msra.mxu1 %v5402_v58  ;;  %v3554_v58 = vld [vmem:[%s6522_s16 + $0x10] sm:$0xff] }
 0xa51   :  { %4870 = vmatprep.subr.bf16.mxu1 %v5696_v37 }
 0xa54   :  { %4871 = vmatpush3.bf16.msra.mxu1 %v5403_v59  ;;  %v5270_v59 = vpack.c.bf16 %v3553_v57, %v3552_v56 }
 0xa55   :  { %4872 = vmatprep.subr.bf16.mxu1 %v5696_v37 }
 0xa58   :  { %4873 = vmatpush3.bf16.msra.mxu1 %v5404_v60  ;;  %v3555_v60 = vld [vmem:[%s6522_s16 + $0x18] sm:$0xff] }
 0xa59   :  { %4874 = vmatprep.subr.bf16.mxu1 %v5696_v37 }
 0xa5c   :  { %4875 = vmatpush3.bf16.msra.mxu1 %v5405_v61  ;;  %v5273_v61 = vpack.c.bf16 %v3555_v60, %v3554_v58 }
 0xa5d   :  { %4876 = vmatprep.subr.bf16.mxu1 %v5696_v37 }
 0xa60   :  { %4877 = vmatpush3.bf16.msra.mxu1 %v5406_v62 }
 0xa61   :  { %4889 = vmatprep.subr.bf16.mxu1 %v5696_v37 }
 0xa63   :  { %4879 = vmatmul.mubr.bf16.vlgmr.msra.gmra.mrb[24].mxu1 %v2577_v63 }
 0xa64   :  { %4890 = vmatpush3.bf16.msra.mxu1 %v5407_v0  ;;  %4905 = vmatprep.mubr.msk.bf16.mxu1 %vm5697_vm7, %v5696_v37 }
 0xa65   :  { %4891 = vmatprep.subr.bf16.mxu1 %v5696_v37 }
 0xa68   :  { %4892 = vmatpush3.bf16.msra.mxu1 %v5408_v1 }
 0xa69   :  { %4893 = vmatprep.subr.bf16.mxu1 %v5696_v37 }
 0xa6c   :  { %4894 = vmatpush3.bf16.msra.mxu1 %v5409_v2 }
 0xa6d   :  { %4895 = vmatprep.subr.bf16.mxu1 %v5696_v37 }
 0xa70   :  { %4896 = vmatpush3.bf16.msra.mxu1 %v5410_v3 }
 0xa71   :  { %4897 = vmatprep.subr.bf16.mxu1 %v5696_v37 }
 0xa74   :  { %4898 = vmatpush3.bf16.msra.mxu1 %v5411_v4  ;;  %v4140_v4 = vld [vmem:[%s6524_s18] ss:$0 sm:$0xff] }
 0xa75   :  { %4899 = vmatprep.subr.bf16.mxu1 %v5696_v37 }
 0xa78   :  { %4900 = vmatpush3.bf16.msra.mxu1 %v5412_v5 }
 0xa79   :  { %4901 = vmatprep.subr.bf16.mxu1 %v5696_v37 }
 0xa7c   :  { %4902 = vmatpush3.bf16.msra.mxu1 %v5413_v6 }
 0xa7d   :  { %4903 = vmatprep.subr.bf16.mxu1 %v5696_v37 }
 0xa80   :  { %4904 = vmatpush3.bf16.msra.mxu1 %v5414_v7 }
 0xa81   :  { %4916 = vmatprep.subr.bf16.mxu1 %v5696_v37 }
 0xa83   :  { %4906 = vmatmul.mubr.bf16.vlgmr.msra.gmra.mrb[24].mxu1 %v2938_v8  ;;  %v3551_v8 = vld [vmem:[%s6523_s17] sm:$0xff] }
 0xa84   :  { %4917 = vmatpush3.bf16.msra.mxu1 %v5415_v9  ;;  %4932 = vmatprep.mubr.msk.bf16.mxu1 %vm5697_vm7, %v5696_v37 }
 0xa85   :  { %4918 = vmatprep.subr.bf16.mxu1 %v5696_v37 }
 0xa88   :  { %4919 = vmatpush3.bf16.msra.mxu1 %v5416_v10 }
 0xa89   :  { %4920 = vmatprep.subr.bf16.mxu1 %v5696_v37 }
 0xa8c   :  { %4921 = vmatpush3.bf16.msra.mxu1 %v5417_v11  ;;  %v4141_v11 = vld [vmem:[%s6525_s19] ss:$0 sm:$0xff] }
 0xa8d   :  { %4922 = vmatprep.subr.bf16.mxu1 %v5696_v37 }
 0xa90   :  { %4923 = vmatpush3.bf16.msra.mxu1 %v5418_v12 }
 0xa91   :  { %4924 = vmatprep.subr.bf16.mxu1 %v5696_v37 }
 0xa94   :  { %4925 = vmatpush3.bf16.msra.mxu1 %v5419_v13 }
 0xa95   :  { %4926 = vmatprep.subr.bf16.mxu1 %v5696_v37 }
 0xa98   :  { %4927 = vmatpush3.bf16.msra.mxu1 %v5420_v14 }
 0xa99   :  { %4928 = vmatprep.subr.bf16.mxu1 %v5696_v37 }
 0xa9c   :  { %4929 = vmatpush3.bf16.msra.mxu1 %v5421_v15 }
 0xa9d   :  { %4930 = vmatprep.subr.bf16.mxu1 %v5696_v37 }
 0xaa0   :  { %4931 = vmatpush3.bf16.msra.mxu1 %v5422_v16 }
 0xaa3   :  { %4933 = vmatmul.mubr.bf16.vlgmr.msra.gmra.mrb[24].mxu1 %v3120_v17 }
 0xb76   :  { %v6379_v25 = vpop.f32.mrb[24].mxu1 }
 0xb77   :  { %v4934_v28 = vpop.f32.mrb[25].mxu1  ;;  %4937 = vmatpush3.msra.mxu0 %v6379_v25  ;;  %v3388_v49 = vmul.f32 %v6379_v25, %v6379_v25 }
 0xb78   :  { %v3223_v29 = vpop.f32.mrb[26].mxu1  ;;  %4939 = vmatmul.mubr.msk.f32.vlgmr.msra.gmra.mrb[32].mxu0 %vm3244_vm13, %v3227_v20  ;;  %5221 = vmatprep.subr.bf16.mxu0 %v5698_v21 }
 0xb79   :  { %v4935_v30 = vpop.f32.mrb[27].mxu1  ;;  %5223 = vmatpush3.bf16.msra.mxu0 %v5222_v23  ;;  %4973 = vmatprep.mubr.msk.f32.mxu0 %vm5697_vm7, %v5696_v37 }
 0xb7a   :  { %5224 = vmatprep.subr.bf16.mxu0 %v5698_v21 }
 0xb7d   :  { %5226 = vmatpush3.bf16.msra.mxu0 %v5225_v31 }
 0xb7e   :  { %5227 = vmatprep.subr.bf16.mxu0 %v5698_v21 }
 0xb81   :  { %5229 = vmatpush3.bf16.msra.mxu0 %v5228_v34 }
 0xb82   :  { %5230 = vmatprep.subr.bf16.mxu0 %v5698_v21 }
 0xb85   :  { %5232 = vmatpush3.bf16.msra.mxu0 %v5231_v22 }
 0xb86   :  { %5233 = vmatprep.subr.bf16.mxu0 %v5698_v21 }
 0xb89   :  { %5235 = vmatpush3.bf16.msra.mxu0 %v5234_v39 }
 0xb8a   :  { %5236 = vmatprep.subr.bf16.mxu0 %v5698_v21 }
 0xb8d   :  { %5238 = vmatpush3.bf16.msra.mxu0 %v5237_v42 }
 0xb8e   :  { %5239 = vmatprep.subr.bf16.mxu0 %v5698_v21 }
 0xb91   :  { %5241 = vmatpush3.bf16.msra.mxu0 %v5240_v45 }
 0xb92   :  { %5242 = vmatprep.subr.bf16.mxu0 %v5698_v21 }
 0xb95   :  { %5244 = vmatpush3.bf16.msra.mxu0 %v5243_v48 }
 0xb96   :  { %4976 = vmatprep.subr.mxu0 %v5696_v37 }
 0xc4b   :  { %v3314_v50 = vpop.f32.mrb[32].mxu0 }
 0xc4c   :  { %v4940_v51 = vpop.f32.mrb[33].mxu0  ;;  %4974 = vmatmul.mubr.f32.vlgmr.msra.gmra.mrb[34].mxu0 %v3314_v50 }
 0xc4d   :  { %4977 = vmatpush3.msra.mxu0 %v3388_v49  ;;  %4978 = vmatprep.mubr.msk.f32.mxu0 %vm5697_vm7, %v5696_v37 }
 0xc4e   :  { %5245 = vmatprep.subr.bf16.mxu0 %v5698_v21 }
 0xc50   :  { %4979 = vmatmul.mubr.msk.f32.vlgmr.msra.gmra.mrb[36].mxu0 %vm3244_vm13, %v3227_v20 }
 0xc51   :  { %5247 = vmatpush3.bf16.msra.mxu0 %v5222_v23  ;;  %5013 = vmatprep.mubr.msk.f32.mxu0 %vm5697_vm7, %v5696_v37  ;;  %v3856_v23 = vld [vmem:[%s6527_s21] sm:$0xff] }
 0xc52   :  { %5248 = vmatprep.subr.bf16.mxu0 %v5698_v21 }
 0xc55   :  { %5250 = vmatpush3.bf16.msra.mxu0 %v5225_v31 }
 0xc56   :  { %5251 = vmatprep.subr.bf16.mxu0 %v5698_v21 }
 0xc59   :  { %5253 = vmatpush3.bf16.msra.mxu0 %v5228_v34 }
 0xc5a   :  { %5254 = vmatprep.subr.bf16.mxu0 %v5698_v21 }
 0xc5d   :  { %5256 = vmatpush3.bf16.msra.mxu0 %v5231_v22 }
 0xc5e   :  { %5257 = vmatprep.subr.bf16.mxu0 %v5698_v21 }
 0xc61   :  { %5259 = vmatpush3.bf16.msra.mxu0 %v5234_v39 }
 0xc62   :  { %5260 = vmatprep.subr.bf16.mxu0 %v5698_v21 }
 0xc65   :  { %5262 = vmatpush3.bf16.msra.mxu0 %v5237_v42 }
 0xc66   :  { %5263 = vmatprep.subr.bf16.mxu0 %v5698_v21 }
 0xc69   :  { %5265 = vmatpush3.bf16.msra.mxu0 %v5240_v45 }
 0xc6a   :  { %5266 = vmatprep.subr.bf16.mxu0 %v5698_v21 }
 0xc6d   :  { %5268 = vmatpush3.bf16.msra.mxu0 %v5243_v48 }
 0xc6e   :  { %5269 = vmatprep.subr.bf16.mxu0 %v5698_v21 }
 0xd1f   :  { %v3384_v52 = vpop.f32.mrb[34].mxu0 }
 0xd20   :  { %v4975_v53 = vpop.f32.mrb[35].mxu0  ;;  %v3529_v62 = vmul.f32 %v3384_v52, %v3384_v52 }
 0xd23   :  { %v3455_v54 = vpop.f32.mrb[36].mxu0 }
 0xd24   :  { %v4980_v55 = vpop.f32.mrb[37].mxu0  ;;  %5014 = vmatmul.mubr.f32.vlgmr.msra.gmra.mrb[38].mxu0 %v3455_v54 }
 0xd25   :  { %5024 = vmatprep.mubr.msk.f32.mxu0 %vm5697_vm7, %v5696_v37  ;;  %5271 = vmatpush3.bf16.msra.mxu0 %v5270_v59 }
 0xd26   :  { %5272 = vmatprep.subr.bf16.mxu0 %v5698_v21 }
 0xd29   :  { %5274 = vmatpush3.bf16.msra.mxu0 %v5273_v61 }
 0xd2a   :  { %5027 = vmatprep.subr.mxu0 %v5696_v37 }
 0xdf7   :  { %v3525_v63 = vpop.f32.mrb[38].mxu0 }
 0xdf8   :  { %v3530_v0 = vsub.f32 %v3525_v63, %v3529_v62  ;;  %v5015_v1 = vpop.f32.mrb[39].mxu0 }
 0xdfa   :  { %v3531_v2 = vmax.f32 %v3530_v0, 0.0 }
 0xdfc   :  { %v3532_v3 = vadd.f32 1e-05, %v3531_v2 }
 0xdfe   :  { %5425 = vrsqrt.f32 %v3532_v3 }
 0xe08   :  { %v5426_v5 = vpop.eup %5425 }
 0xe09   :  { %v3541_v6 = vmul.f32 %v5426_v5, %v4140_v4 }
 0xe0b   :  { %5025 = vmatmul.mubr.msk.f32.vlgmr.msra.gmra.mrb[40].mxu0 %vm1089_vm2, %v3541_v6  ;;  %v3543_v7 = vmul.f32 %v3541_v6, %v3384_v52 }
 0xe0c   :  { %5029 = vmatprep.mubr.msk.f32.mxu0 %vm5697_vm7, %v5696_v37 }
 0xe0d   :  { %v3550_v12 = vsub.f32 %v4141_v11, %v3543_v7 }
 0xede   :  { %v3625_v9 = vpop.f32.mrb[40].mxu0 }
 0xedf   :  { %v5026_v10 = vpop.f32.mrb[41].mxu0  ;;  %5028 = vmatpush3.msk.msra.mxu0 %vm2263_vm10, %v3625_v9 }
 0xee0   :  { %5030 = vmatmul.mubr.msk.f32.vlgmr.msra.gmra.mrb[42].mxu0 %vm2256_vm9, %v3551_v8  ;;  %5275 = vmatprep.subr.bf16.mxu0 %v5698_v21 }
 0xee1   :  { %5277 = vmatpush3.bf16.msra.mxu0 %v5270_v59  ;;  %5040 = vmatprep.mubr.msk.f32.mxu0 %vm5697_vm7, %v5696_v37 }
 0xee2   :  { %5278 = vmatprep.subr.bf16.mxu0 %v5698_v21 }
 0xee5   :  { %5280 = vmatpush3.bf16.msra.mxu0 %v5273_v61 }
 0xee6   :  { %5043 = vmatprep.subr.mxu0 %v5696_v37 }
 0xee8   :  { %5041 = vmatmul.mubr.msk.f32.vlgmr.msra.gmra.mrb[44].mxu0 %vm1089_vm2, %v3550_v12 }
 0xee9   :  { %5045 = vmatprep.mubr.msk.f32.mxu0 %vm5697_vm7, %v5696_v37 }
 0xfb3   :  { %v3701_v13 = vpop.f32.mrb[42].mxu0 }
 0xfb4   :  { %v3851_v14 = vmul.f32 %v3701_v13, %v6379_v25  ;;  %v5031_v15 = vpop.f32.mrb[43].mxu0 }
 0xfbb   :  { %v3774_v16 = vpop.f32.mrb[44].mxu0 }
 0xfbc   :  { %v5042_v17 = vpop.f32.mrb[45].mxu0  ;;  %5044 = vmatpush3.msk.msra.mxu0 %vm2263_vm10, %v3774_v16 }
 0xfbd   :  { %5046 = vmatmul.mubr.msk.f32.vlgmr.msra.gmra.mrb[46].mxu0 %vm2256_vm9, %v3551_v8  ;;  %5048 = vmatprep.subr.mxu0 %v5696_v37 }
 0xfbe   :  { %5050 = vmatprep.mubr.msk.f32.mxu0 %vm5697_vm7, %v5696_v37  ;;  %v4148_v37 = vld [vmem:[#allocation2] ss:$0 sm:$0xff] }
0x1090   :  { %v3847_v21 = vpop.f32.mrb[46].mxu0 }
0x1091   :  { %v3852_v18 = vadd.f32 %v3851_v14, %v3847_v21  ;;  %v5047_v19 = vpop.f32.mrb[47].mxu0 }
0x1093   :  { %v3854_v20 = vmul.f32 0.2, %v3852_v18  ;;  %vm3853_vm14 = vcmp.gt.f32.partialorder %v3852_v18, 0.0 }
0x1095   :  { %v3855_v25 = vsel %vm3853_vm14, %v3852_v18, %v3854_v20 }
0x1096   :  { %v3857_v26 = vmul.f32 %v3856_v23, %v3855_v25 }
0x1098   :  { %3858 = vadd.xlane.f32.xlu0 %v3857_v26 }
0x1125   :  { %v3859_v28 = vpop.xlane.xlu0 %3858 }
0x1126   :  { %5049 = vmatpush3.msra.mxu0 %v3859_v28 }
0x1127   :  { %5051 = vmatmul.mubr.msk.f32.vlgmr.msra.gmra.mrb[48].mxu0 %vm3244_vm13, %v3860_v27 }
0x11fa   :  { %v3937_v29 = vpop.f32.mrb[48].mxu0 }
0x11fb   :  { %v3938_v30 = vadd.f32 %v4148_v37, %v3937_v29  ;;  %v5052_v31 = vpop.f32.mrb[49].mxu0 }
0x11fd   :  { %3942 = vst.msk [vmem:[%s6557_s26] sm:$0x3] %vm3941_vm15, %v3938_v30 }
0x11fe   :  { %3947 = vsyncpa [#allocation4], 1 }
0x11ff   :  { %3948 = vsyncpa [#allocation6], 1 }
0x1200   :  { %3949 = vsyncpa [#allocation9], 1 }
0x1201   :  { %3950 = vsyncpa [#allocation12], 1 }
0x1202   :  { %3951 = vsyncpa [#allocation15], 1 }
0x1203   :  { %3952 = vsyncpa [#allocation18], 1 }

</bundles_post_ra>
